<compile_context>
chip_gen: v7x
topology: tpu7x:2x2x1
jax: 0.10.0
libtpu: 0.0.40
codegen_flags: <defaults>
</compile_context>

<pallas_src>
import numpy as np
import jax
import jax.numpy as jnp
from jax.experimental import pallas as pl
from jax.experimental.pallas import tpu as pltpu

T_SHIFT, T_REDUCE, T_SKIP = 0, 1, 2
NKPAD = 128  # lane-padded width of the transition-logit output


# ----------------------------- fused Pallas kernel -----------------------------

def _spinn_kernel(sched_ref,                                   # SMEM (T, 3+5B) int32
                  bufh_ref, bufc_ref,                          # (B*BCAP, size) resident
                  w_buf_ref, w_s1_ref, w_s2_ref,               # tracker input weights
                  w_lat_ref, b_lat_ref,                        # tracker lateral
                  w_tr_ref, b_tr_ref,                          # transition net (padded)
                  w_left_ref, w_right_ref, w_track_ref, b_red_ref,  # TreeLSTM reduce
                  logp_ref, stkh_ref, stkc_ref,                # outputs (all resident)
                  trkh_sc, trkc_sc):                           # tracker state scratch
    t = pl.program_id(0)
    B, ts = trkh_sc.shape
    size = stkh_ref.shape[1]
    C_ACT, C_BUF, C_S1, C_S2, C_WR = 3, 3 + B, 3 + 2 * B, 3 + 3 * B, 3 + 4 * B

    @pl.when(t == 0)
    def _init():
        stkh_ref[...] = jnp.zeros_like(stkh_ref)
        stkc_ref[...] = jnp.zeros_like(stkc_ref)
        trkh_sc[...] = jnp.zeros_like(trkh_sc)
        trkc_sc[...] = jnp.zeros_like(trkc_sc)
        logp_ref[...] = jnp.zeros_like(logp_ref)   # all-SKIP steps stay well-defined

    run = sched_ref[t, 0]       # tracker runs this step?  (any non-SKIP row)
    lat = sched_ref[t, 1]       # tracker.h already exists?
    any_red = sched_ref[t, 2]   # any REDUCE row this step?

    @pl.when(run > 0)
    def _step():
        # ---- gather current tops via per-row dynamic slices (SMEM indices) ----
        def gather(ref_h, ref_c, col):
            hs, cs = [], []
            for b in range(B):
                idx = sched_ref[t, col + b]
                hs.append(ref_h[pl.ds(idx, 1), :])
                cs.append(ref_c[pl.ds(idx, 1), :])
            if B == 1:
                return hs[0], cs[0]
            return jnp.concatenate(hs, axis=0), jnp.concatenate(cs, axis=0)

        buf_h, buf_c = gather(bufh_ref, bufc_ref, C_BUF)     # (B, size) buffer top
        s1_h, s1_c = gather(stkh_ref, stkc_ref, C_S1)        # stack[-1]
        s2_h, s2_c = gather(stkh_ref, stkc_ref, C_S2)        # stack[-2]

        # ---- Tracker LSTM: three separate dots (no lane-unaligned concat) ----
        g = (jnp.dot(buf_h, w_buf_ref[...], preferred_element_type=jnp.float32)
             + jnp.dot(s1_h, w_s1_ref[...], preferred_element_type=jnp.float32)
             + jnp.dot(s2_h, w_s2_ref[...], preferred_element_type=jnp.float32))
        lateral = jnp.dot(trkh_sc[...], w_lat_ref[...],
                          preferred_element_type=jnp.float32) + b_lat_ref[...]
        g = g + jnp.where(lat > 0, 1.0, 0.0) * lateral   # no lateral before 1st run

        a = g[:, 0 * ts:1 * ts]
        i = g[:, 1 * ts:2 * ts]
        f = g[:, 2 * ts:3 * ts]
        o = g[:, 3 * ts:4 * ts]
        c_new = jnp.tanh(a) * jax.nn.sigmoid(i) + jax.nn.sigmoid(f) * trkc_sc[...]
        h_new = jax.nn.sigmoid(o) * jnp.tanh(c_new)
        trkh_sc[...] = h_new
        trkc_sc[...] = c_new

        # ---- transition log-probs (lane-padded to 128; pad bias = -1e30) ----
        logits = jnp.dot(h_new, w_tr_ref[...],
                         preferred_element_type=jnp.float32) + b_tr_ref[...]
        m = jnp.max(logits, axis=-1, keepdims=True)
        lse = m + jnp.log(jnp.sum(jnp.exp(logits - m), axis=-1, keepdims=True))
        logp_ref[t, :, :] = logits - lse

        # ---- SHIFT: targeted single-row pushes of the buffer top ----
        for b in range(B):
            act_b = sched_ref[t, C_ACT + b]
            wr_b = sched_ref[t, C_WR + b]

            @pl.when(act_b == T_SHIFT)
            def _push_shift(b=b, wr_b=wr_b):
                stkh_ref[pl.ds(wr_b, 1), :] = buf_h[b:b + 1, :]
                stkc_ref[pl.ds(wr_b, 1), :] = buf_c[b:b + 1, :]

        # ---- REDUCE (TreeLSTM), only on steps that contain a REDUCE row ----
        @pl.when(any_red > 0)
        def _reduce():
            # left = stack[-2] (s2), right = stack[-1] (s1); post-update tracker h.
            rg = (jnp.dot(s2_h, w_left_ref[...], preferred_element_type=jnp.float32)
                  + jnp.dot(s1_h, w_right_ref[...], preferred_element_type=jnp.float32)
                  + jnp.dot(h_new, w_track_ref[...], preferred_element_type=jnp.float32)
                  + b_red_ref[...])
            ig = rg[:, 0 * size:1 * size]
            fl = rg[:, 1 * size:2 * size]
            fr = rg[:, 2 * size:3 * size]
            ci = rg[:, 3 * size:4 * size]
            og = rg[:, 4 * size:5 * size]
            rc = (jax.nn.sigmoid(fl) * s2_c + jax.nn.sigmoid(fr) * s1_c
                  + jax.nn.sigmoid(ig) * jnp.tanh(ci))
            rh = jax.nn.sigmoid(og) * jnp.tanh(rc)

            for b in range(B):
                act_b = sched_ref[t, C_ACT + b]
                wr_b = sched_ref[t, C_WR + b]

                @pl.when(act_b == T_REDUCE)
                def _push_reduce(b=b, wr_b=wr_b):
                    stkh_ref[pl.ds(wr_b, 1), :] = rh[b:b + 1, :]
                    stkc_ref[pl.ds(wr_b, 1), :] = rc[b:b + 1, :]


# ----------------------------- pallas_call wrapper -----------------------------

def _res2(shape):
    return pl.BlockSpec(shape, lambda t, s: (0, 0))


def spinn_fused(sched, buf_h, buf_c, pp, *, B, CAP, size, tracker_size):
    T = sched.shape[0]
    NBUF = buf_h.shape[0]           # B * BCAP
    NSTK = B * CAP
    ts = tracker_size
    NKP = pp["w_tr"].shape[1]

    grid_spec = pltpu.PrefetchScalarGridSpec(
        num_scalar_prefetch=1,
        grid=(T,),
        in_specs=[
            _res2((NBUF, size)),            # buf_h   (resident whole sequence)
            _res2((NBUF, size)),            # buf_c
            _res2((size, 4 * ts)),          # w_buf
            _res2((size, 4 * ts)),          # w_stack1
            _res2((size, 4 * ts)),          # w_stack2
            _res2((ts, 4 * ts)),            # w_lateral
            _res2((1, 4 * ts)),             # b_lateral
            _res2((ts, NKP)),               # w_trans (lane-padded)
            _res2((1, NKP)),                # b_trans (lane-padded)
            _res2((size, 5 * size)),        # w_left
            _res2((size, 5 * size)),        # w_right
            _res2((ts, 5 * size)),          # w_track
            _res2((1, 5 * size)),           # b_reduce
        ],
        out_specs=[
            pl.BlockSpec((T, B, NKP), lambda t, s: (0, 0, 0)),   # logp (resident)
            _res2((NSTK, size)),            # stack_h (on-chip state)
            _res2((NSTK, size)),            # stack_c
        ],
        scratch_shapes=[pltpu.VMEM((B, ts), jnp.float32),   # tracker h
                        pltpu.VMEM((B, ts), jnp.float32)],  # tracker c
    )
    return pl.pallas_call(
        _spinn_kernel,
        grid_spec=grid_spec,
        out_shape=(jax.ShapeDtypeStruct((T, B, NKP), jnp.float32),
                   jax.ShapeDtypeStruct((NSTK, size), jnp.float32),
                   jax.ShapeDtypeStruct((NSTK, size), jnp.float32)),
        compiler_params=pltpu.CompilerParams(
            dimension_semantics=("arbitrary",)),
    )(sched, buf_h, buf_c,
      pp["w_buf"], pp["w_s1"], pp["w_s2"], pp["w_lat"], pp["b_lat"],
      pp["w_tr"], pp["b_tr"],
      pp["w_left"], pp["w_right"], pp["w_track"], pp["b_red"])


# ----------------------------- parameters -----------------------------

def init_params(key, size, tracker_size, n_classes=2):
    ks = jax.random.split(key, 10)

    def w(k, shp):
        return (0.1 * jax.random.normal(k, shp)).astype(jnp.float32)

    return dict(
        # Tracker (buf/stack1/stack2 Linears have no bias; lateral has bias)
        w_buf=w(ks[0], (size, 4 * tracker_size)),
        w_stack1=w(ks[1], (size, 4 * tracker_size)),
        w_stack2=w(ks[2], (size, 4 * tracker_size)),
        w_lateral=w(ks[3], (tracker_size, 4 * tracker_size)),
        b_lateral=w(ks[4], (1, 4 * tracker_size)),
        # transition_net : Linear(tracker_size, 2)  (use_skips=False)
        w_trans=w(ks[5], (tracker_size, n_classes)),
        b_trans=w(ks[6], (1, n_classes)),
        # Reduce (TreeLSTM composition)
        w_left=w(ks[7], (size, 5 * size)),
        b_left=jnp.zeros((1, 5 * size), jnp.float32),
        w_right=w(ks[8], (size, 5 * size)),
        w_track=w(ks[9], (tracker_size, 5 * size)),
    )


def pack_params(p, size, tracker_size):
    """Lane-pad the transition net once (host side); other weights pass as-is."""
    nk = p["w_trans"].shape[1]
    w_tr = jnp.zeros((tracker_size, NKPAD), jnp.float32).at[:, :nk].set(p["w_trans"])
    # pad bias = -1e30 (finite in f32) so padded lanes never affect the softmax
    b_tr = jnp.full((1, NKPAD), -1e30, jnp.float32).at[:, :nk].set(p["b_trans"])
    return dict(
        w_buf=p["w_buf"], w_s1=p["w_stack1"], w_s2=p["w_stack2"],
        w_lat=p["w_lateral"], b_lat=p["b_lateral"],
        w_tr=w_tr, b_tr=b_tr,
        w_left=p["w_left"], w_right=p["w_right"], w_track=p["w_track"],
        b_red=p["b_left"],
    )


# ----------------------------- host-side schedule -----------------------------

def build_schedule(tokens_np, transitions_np, L):
    """Deterministic simulation of SPINN's stack/buffer bookkeeping, vectorized
    over the batch.  Produces ONE small int32 table (scalar-prefetched to SMEM)
    holding, per step: [run, lateral_exists, any_reduce,
                        act[b]..., buf_row[b]..., s1_row[b]..., s2_row[b]..., write_row[b]...]."""
    B, T = transitions_np.shape
    buffers_n = (tokens_np != 0).sum(axis=1).astype(np.int64)
    BCAP = L + 1              # slot 0 = zeros, slots 1..n = embeddings
    CAP = L + 3               # initial 2 zeros + up to L pushes + 1 zero slot
    ZSLOT = CAP - 1           # never written; always zero (underflow fallback)

    NCOLS = 3 + 5 * B
    sched = np.zeros((T, NCOLS), np.int32)
    C_ACT, C_BUF, C_S1, C_S2, C_WR = 3, 3 + B, 3 + 2 * B, 3 + 3 * B, 3 + 4 * B
    base_buf = np.arange(B, dtype=np.int64) * BCAP
    base_stk = np.arange(B, dtype=np.int64) * CAP

    buf_ptr = buffers_n.copy()
    sp = np.full((B,), 2, np.int64)
    seen_tracker = 0
    memories = []
    for t in range(T):
        tr = transitions_np[:, t].astype(np.int64)
        cant_skip = tr != T_SKIP
        run = int(cant_skip.any())
        any_red = int((tr == T_REDUCE).any())
        sched[t, 0] = run
        sched[t, 1] = seen_tracker
        sched[t, 2] = any_red
        if run:
            memories.append(dict(
                step=t,
                given=tr.copy(),
                cant_skip=cant_skip.copy(),
                stack_lens=(sp - 2).copy(),
                buf_lens=buf_ptr.copy(),
            ))
            seen_tracker = 1

        i1 = np.where(sp >= 1, sp - 1, ZSLOT)
        i2 = np.where(sp >= 2, sp - 2, ZSLOT)
        shift_m = tr == T_SHIFT
        red_m = tr == T_REDUCE
        wr = np.where(shift_m, sp, np.where(red_m, np.maximum(sp - 2, 0), ZSLOT))

        sched[t, C_ACT:C_ACT + B] = tr
        sched[t, C_BUF:C_BUF + B] = base_buf + buf_ptr
        sched[t, C_S1:C_S1 + B] = base_stk + i1
        sched[t, C_S2:C_S2 + B] = base_stk + i2
        sched[t, C_WR:C_WR + B] = base_stk + wr

        sp = np.where(shift_m, sp + 1, np.where(red_m, np.maximum(sp - 2, 0) + 1, sp))
        buf_ptr = np.where(shift_m, np.maximum(buf_ptr - 1, 0), buf_ptr)

    return dict(sched=sched, memories=memories,
                final_top=(sp - 1).astype(np.int64), BCAP=BCAP, CAP=CAP)


def build_buffers(buf_embeds, tokens_np, size, BCAP):
    be = np.asarray(buf_embeds)
    B, L, D = be.shape
    buffers_n = (tokens_np != 0).sum(axis=1)
    buf_h = np.zeros((B * BCAP, size), np.float32)
    buf_c = np.zeros((B * BCAP, size), np.float32)
    for b in range(B):
        n = int(buffers_n[b])
        if n > 0:
            items = be[b, L - n:]                   # last n embeddings, in order
            buf_h[b * BCAP + 1: b * BCAP + 1 + n] = items[:, :size]
            buf_c[b * BCAP + 1: b * BCAP + 1 + n] = items[:, size:]
    return jnp.asarray(buf_h), jnp.asarray(buf_c)


# ----------------------------- SPINN forward -----------------------------

def spinn_forward(tokens, buf_embeds, transitions, params, size, tracker_size,
                  transition_weight=1.0):
    """Mirrors SPINN.forward / SPINN.run with use_internal_parser=False,
    validate_transitions=True, use_skips=False, lateral_tracking=True."""
    tokens_np = np.asarray(tokens)
    trans_np = np.asarray(transitions).astype(np.int64)
    B, L, D = buf_embeds.shape
    assert D == 2 * size
    nk = params["w_trans"].shape[1]

    sched = build_schedule(tokens_np, trans_np, L)
    buf_h, buf_c = build_buffers(buf_embeds, tokens_np, size, sched["BCAP"])
    packed = pack_params(params, size, tracker_size)

    logp_all, stk_h, stk_c = spinn_fused(
        jnp.asarray(sched["sched"]), buf_h, buf_c, packed,
        B=B, CAP=sched["CAP"], size=size, tracker_size=tracker_size)

    # --- transition accuracy / NLL loss (host numpy, as in the reference) ---
    logp_np = np.asarray(logp_all)[:, :, :nk]
    all_logps, all_given, all_preds = [], [], []
    for m in sched["memories"]:
        logp = logp_np[m["step"]]
        preds = logp.argmax(axis=1)
        preds[m["stack_lens"] < 2] = T_SHIFT          # must shift
        preds[m["buf_lens"] < 1] = T_REDUCE           # must reduce
        preds[m["given"] == T_SKIP] = T_SKIP
        sel = m["cant_skip"]
        all_logps.append(logp[sel])
        all_given.append(m["given"][sel])
        all_preds.append(preds[sel])
    all_logps = np.concatenate(all_logps, 0)
    all_given = np.concatenate(all_given, 0)
    all_preds = np.concatenate(all_preds, 0)

    transition_acc = float((all_preds == all_given).sum()) / float(all_preds.shape[0])
    nll = -float(np.mean(all_logps[np.arange(all_logps.shape[0]), all_given]))
    transition_loss = nll * transition_weight

    # final sentence encodings = [h | c] of the top stack item per example
    CAP = sched["CAP"]
    finals = []
    for b in range(B):
        idx = b * CAP + int(sched["final_top"][b])
        finals.append(jnp.concatenate([stk_h[idx], stk_c[idx]]))
    final = jnp.stack(finals)                         # (B, 2*size)
    return final, transition_acc, transition_loss


# ----------------------------- main -----------------------------

if __name__ == "__main__":
    size, tracker_size = 32, 16          # args.size, args.tracker_size
    B, L = 2, 8

    key = jax.random.PRNGKey(0)
    kp, kb = jax.random.split(key)
    params = init_params(kp, size, tracker_size)

    # buffer items (already [h | c] encoded), tokens (0 = pad), transitions
    buf_embeds = (0.5 * jax.random.normal(kb, (B, L, 2 * size))).astype(jnp.float32)
    tokens = np.array([[0, 0, 0, 3, 4, 5, 6, 7],       # 5 real tokens
                       [0, 0, 0, 0, 2, 3, 4, 5]],      # 4 real tokens
                      dtype=np.int32)
    transitions = np.array([[0, 0, 1, 0, 1, 0, 1, 0, 1],        # full parse
                            [0, 0, 1, 0, 1, 0, 1, 2, 2]],       # parse + SKIP pad
                           dtype=np.int32)

    final, acc, loss = spinn_forward(tokens, buf_embeds, transitions, params,
                                     size, tracker_size, transition_weight=1.0)
    final = jax.block_until_ready(final)
    assert final.shape == (B, 2 * size)
    assert np.all(np.isfinite(np.asarray(final)))
    assert np.isfinite(acc) and np.isfinite(loss)
    print("KERNEL_OK")
</pallas_src>

<mosaic_0001>
module attributes {stable_mosaic.version = 11 : i64} {
  func.func @_spinn_kernel(%arg0: i32, %arg1: memref<9x13xi32, #tpu.memory_space<smem>>, %arg2: memref<18x32xf32, #tpu.memory_space<vmem>>, %arg3: memref<18x32xf32, #tpu.memory_space<vmem>>, %arg4: memref<32x64xf32, #tpu.memory_space<vmem>>, %arg5: memref<32x64xf32, #tpu.memory_space<vmem>>, %arg6: memref<32x64xf32, #tpu.memory_space<vmem>>, %arg7: memref<16x64xf32, #tpu.memory_space<vmem>>, %arg8: memref<1x64xf32, #tpu.memory_space<vmem>>, %arg9: memref<16x128xf32, #tpu.memory_space<vmem>>, %arg10: memref<1x128xf32, #tpu.memory_space<vmem>>, %arg11: memref<32x160xf32, #tpu.memory_space<vmem>>, %arg12: memref<32x160xf32, #tpu.memory_space<vmem>>, %arg13: memref<16x160xf32, #tpu.memory_space<vmem>>, %arg14: memref<1x160xf32, #tpu.memory_space<vmem>>, %arg15: memref<9x2x128xf32, #tpu.memory_space<vmem>>, %arg16: memref<22x32xf32, #tpu.memory_space<vmem>>, %arg17: memref<22x32xf32, #tpu.memory_space<vmem>>, %arg18: memref<2x16xf32, #tpu.memory_space<vmem>>, %arg19: memref<2x16xf32, #tpu.memory_space<vmem>>) attributes {dimension_semantics = [#tpu.dimension_semantics<arbitrary>], iteration_bounds = array<i64: 9>, scalar_prefetch = 1 : i64, scratch_operands = 2 : i64, tpu.core_type = #tpu.core_type<tc>, window_params = [{pipeline_mode = #tpu.pipeline_mode<synchronous>, transform_indices = @transform_0, window_bounds = array<i64: 18, 32>}, {pipeline_mode = #tpu.pipeline_mode<synchronous>, transform_indices = @transform_1, window_bounds = array<i64: 18, 32>}, {pipeline_mode = #tpu.pipeline_mode<synchronous>, transform_indices = @transform_2, window_bounds = array<i64: 32, 64>}, {pipeline_mode = #tpu.pipeline_mode<synchronous>, transform_indices = @transform_3, window_bounds = array<i64: 32, 64>}, {pipeline_mode = #tpu.pipeline_mode<synchronous>, transform_indices = @transform_4, window_bounds = array<i64: 32, 64>}, {pipeline_mode = #tpu.pipeline_mode<synchronous>, transform_indices = @transform_5, window_bounds = array<i64: 16, 64>}, {pipeline_mode = #tpu.pipeline_mode<synchronous>, transform_indices = @transform_6, window_bounds = array<i64: 1, 64>}, {pipeline_mode = #tpu.pipeline_mode<synchronous>, transform_indices = @transform_7, window_bounds = array<i64: 16, 128>}, {pipeline_mode = #tpu.pipeline_mode<synchronous>, transform_indices = @transform_8, window_bounds = array<i64: 1, 128>}, {pipeline_mode = #tpu.pipeline_mode<synchronous>, transform_indices = @transform_9, window_bounds = array<i64: 32, 160>}, {pipeline_mode = #tpu.pipeline_mode<synchronous>, transform_indices = @transform_10, window_bounds = array<i64: 32, 160>}, {pipeline_mode = #tpu.pipeline_mode<synchronous>, transform_indices = @transform_11, window_bounds = array<i64: 16, 160>}, {pipeline_mode = #tpu.pipeline_mode<synchronous>, transform_indices = @transform_12, window_bounds = array<i64: 1, 160>}, {pipeline_mode = #tpu.pipeline_mode<synchronous>, transform_indices = @transform_13, window_bounds = array<i64: 9, 2, 128>}, {pipeline_mode = #tpu.pipeline_mode<synchronous>, transform_indices = @transform_14, window_bounds = array<i64: 22, 32>}, {pipeline_mode = #tpu.pipeline_mode<synchronous>, transform_indices = @transform_15, window_bounds = array<i64: 22, 32>}]} {
    %c0_i32 = arith.constant 0 : i32
    %0 = arith.cmpi eq, %arg0, %c0_i32 : i32
    %1 = arith.extui %0 : i1 to i32
    %c0_i32_0 = arith.constant 0 : i32
    %2 = arith.cmpi ne, %1, %c0_i32_0 : i32
    scf.if %2 {
      %cst = arith.constant 0.000000e+00 : f32
      %12 = vector.broadcast %cst : f32 to vector<22x32xf32>
      %c0_3 = arith.constant 0 : index
      %c0_4 = arith.constant 0 : index
      %13 = vector.load %arg16[%c0_3, %c0_4] : memref<22x32xf32, #tpu.memory_space<vmem>>, vector<22x32xf32>
      tpu.vector_store %arg16[%c0_3, %c0_4], %12 {strides = array<i32>} : memref<22x32xf32, #tpu.memory_space<vmem>>, vector<22x32xf32>,
      %cst_5 = arith.constant 0.000000e+00 : f32
      %14 = vector.broadcast %cst_5 : f32 to vector<22x32xf32>
      %c0_6 = arith.constant 0 : index
      %c0_7 = arith.constant 0 : index
      %15 = vector.load %arg17[%c0_6, %c0_7] : memref<22x32xf32, #tpu.memory_space<vmem>>, vector<22x32xf32>
      tpu.vector_store %arg17[%c0_6, %c0_7], %14 {strides = array<i32>} : memref<22x32xf32, #tpu.memory_space<vmem>>, vector<22x32xf32>,
      %cst_8 = arith.constant 0.000000e+00 : f32
      %16 = vector.broadcast %cst_8 : f32 to vector<2x16xf32>
      %c0_9 = arith.constant 0 : index
      %c0_10 = arith.constant 0 : index
      %17 = vector.load %arg18[%c0_9, %c0_10] : memref<2x16xf32, #tpu.memory_space<vmem>>, vector<2x16xf32>
      tpu.vector_store %arg18[%c0_9, %c0_10], %16 {strides = array<i32>} : memref<2x16xf32, #tpu.memory_space<vmem>>, vector<2x16xf32>,
      %cst_11 = arith.constant 0.000000e+00 : f32
      %18 = vector.broadcast %cst_11 : f32 to vector<2x16xf32>
      %c0_12 = arith.constant 0 : index
      %c0_13 = arith.constant 0 : index
      %19 = vector.load %arg19[%c0_12, %c0_13] : memref<2x16xf32, #tpu.memory_space<vmem>>, vector<2x16xf32>
      tpu.vector_store %arg19[%c0_12, %c0_13], %18 {strides = array<i32>} : memref<2x16xf32, #tpu.memory_space<vmem>>, vector<2x16xf32>,
      %cst_14 = arith.constant 0.000000e+00 : f32
      %20 = vector.broadcast %cst_14 : f32 to vector<9x2x128xf32>
      %c0_15 = arith.constant 0 : index
      %c0_16 = arith.constant 0 : index
      %c0_17 = arith.constant 0 : index
      %21 = vector.load %arg15[%c0_15, %c0_16, %c0_17] : memref<9x2x128xf32, #tpu.memory_space<vmem>>, vector<9x2x128xf32>
      tpu.vector_store %arg15[%c0_15, %c0_16, %c0_17], %20 {strides = array<i32>} : memref<9x2x128xf32, #tpu.memory_space<vmem>>, vector<9x2x128xf32>,
    } else {
    }
    %3 = arith.index_cast %arg0 : i32 to index
    %c0 = arith.constant 0 : index
    %4 = memref.load %arg1[%3, %c0] : memref<9x13xi32, #tpu.memory_space<smem>>
    %5 = arith.index_cast %arg0 : i32 to index
    %c1 = arith.constant 1 : index
    %6 = memref.load %arg1[%5, %c1] : memref<9x13xi32, #tpu.memory_space<smem>>
    %7 = arith.index_cast %arg0 : i32 to index
    %c2 = arith.constant 2 : index
    %8 = memref.load %arg1[%7, %c2] : memref<9x13xi32, #tpu.memory_space<smem>>
    %c0_i32_1 = arith.constant 0 : i32
    %9 = arith.cmpi sgt, %4, %c0_i32_1 : i32
    %10 = arith.extui %9 : i1 to i32
    %c0_i32_2 = arith.constant 0 : i32
    %11 = arith.cmpi ne, %10, %c0_i32_2 : i32
    scf.if %11 {
      %12 = arith.index_cast %arg0 : i32 to index
      %c5 = arith.constant 5 : index
      %13 = memref.load %arg1[%12, %c5] : memref<9x13xi32, #tpu.memory_space<smem>>
      %14 = arith.index_cast %13 : i32 to index
      %c0_3 = arith.constant 0 : index
      %15 = vector.load %arg2[%14, %c0_3] : memref<18x32xf32, #tpu.memory_space<vmem>>, vector<1x32xf32>
      %16 = arith.index_cast %13 : i32 to index
      %c0_4 = arith.constant 0 : index
      %17 = vector.load %arg3[%16, %c0_4] : memref<18x32xf32, #tpu.memory_space<vmem>>, vector<1x32xf32>
      %18 = arith.index_cast %arg0 : i32 to index
      %c6 = arith.constant 6 : index
      %19 = memref.load %arg1[%18, %c6] : memref<9x13xi32, #tpu.memory_space<smem>>
      %20 = arith.index_cast %19 : i32 to index
      %c0_5 = arith.constant 0 : index
      %21 = vector.load %arg2[%20, %c0_5] : memref<18x32xf32, #tpu.memory_space<vmem>>, vector<1x32xf32>
      %22 = arith.index_cast %19 : i32 to index
      %c0_6 = arith.constant 0 : index
      %23 = vector.load %arg3[%22, %c0_6] : memref<18x32xf32, #tpu.memory_space<vmem>>, vector<1x32xf32>
      %24 = tpu.concatenate %15, %21 in 0 : vector<1x32xf32>, vector<1x32xf32> -> vector<2x32xf32>
      %25 = tpu.concatenate %17, %23 in 0 : vector<1x32xf32>, vector<1x32xf32> -> vector<2x32xf32>
      %26 = arith.index_cast %arg0 : i32 to index
      %c7 = arith.constant 7 : index
      %27 = memref.load %arg1[%26, %c7] : memref<9x13xi32, #tpu.memory_space<smem>>
      %28 = arith.index_cast %27 : i32 to index
      %c0_7 = arith.constant 0 : index
      %29 = vector.load %arg16[%28, %c0_7] : memref<22x32xf32, #tpu.memory_space<vmem>>, vector<1x32xf32>
      %30 = arith.index_cast %27 : i32 to index
      %c0_8 = arith.constant 0 : index
      %31 = vector.load %arg17[%30, %c0_8] : memref<22x32xf32, #tpu.memory_space<vmem>>, vector<1x32xf32>
      %32 = arith.index_cast %arg0 : i32 to index
      %c8 = arith.constant 8 : index
      %33 = memref.load %arg1[%32, %c8] : memref<9x13xi32, #tpu.memory_space<smem>>
      %34 = arith.index_cast %33 : i32 to index
      %c0_9 = arith.constant 0 : index
      %35 = vector.load %arg16[%34, %c0_9] : memref<22x32xf32, #tpu.memory_space<vmem>>, vector<1x32xf32>
      %36 = arith.index_cast %33 : i32 to index
      %c0_10 = arith.constant 0 : index
      %37 = vector.load %arg17[%36, %c0_10] : memref<22x32xf32, #tpu.memory_space<vmem>>, vector<1x32xf32>
      %38 = tpu.concatenate %29, %35 in 0 : vector<1x32xf32>, vector<1x32xf32> -> vector<2x32xf32>
      %39 = tpu.concatenate %31, %37 in 0 : vector<1x32xf32>, vector<1x32xf32> -> vector<2x32xf32>
      %40 = arith.index_cast %arg0 : i32 to index
      %c9 = arith.constant 9 : index
      %41 = memref.load %arg1[%40, %c9] : memref<9x13xi32, #tpu.memory_space<smem>>
      %42 = arith.index_cast %41 : i32 to index
      %c0_11 = arith.constant 0 : index
      %43 = vector.load %arg16[%42, %c0_11] : memref<22x32xf32, #tpu.memory_space<vmem>>, vector<1x32xf32>
      %44 = arith.index_cast %41 : i32 to index
      %c0_12 = arith.constant 0 : index
      %45 = vector.load %arg17[%44, %c0_12] : memref<22x32xf32, #tpu.memory_space<vmem>>, vector<1x32xf32>
      %46 = arith.index_cast %arg0 : i32 to index
      %c10 = arith.constant 10 : index
      %47 = memref.load %arg1[%46, %c10] : memref<9x13xi32, #tpu.memory_space<smem>>
      %48 = arith.index_cast %47 : i32 to index
      %c0_13 = arith.constant 0 : index
      %49 = vector.load %arg16[%48, %c0_13] : memref<22x32xf32, #tpu.memory_space<vmem>>, vector<1x32xf32>
      %50 = arith.index_cast %47 : i32 to index
      %c0_14 = arith.constant 0 : index
      %51 = vector.load %arg17[%50, %c0_14] : memref<22x32xf32, #tpu.memory_space<vmem>>, vector<1x32xf32>
      %52 = tpu.concatenate %43, %49 in 0 : vector<1x32xf32>, vector<1x32xf32> -> vector<2x32xf32>
      %53 = tpu.concatenate %45, %51 in 0 : vector<1x32xf32>, vector<1x32xf32> -> vector<2x32xf32>
      %c0_15 = arith.constant 0 : index
      %c0_16 = arith.constant 0 : index
      %54 = vector.load %arg4[%c0_15, %c0_16] : memref<32x64xf32, #tpu.memory_space<vmem>>, vector<32x64xf32>
      %cst = arith.constant dense<0.000000e+00> : vector<2x64xf32>
      %55 = tpu.matmul %24, %54, %cst {dimension_numbers = #tpu.dot_dimension_numbers<[1], [0], [0], [1], [0, 0, 1, 1], [], []>} : vector<2x32xf32>, vector<32x64xf32>, vector<2x64xf32> -> vector<2x64xf32>
      %c0_17 = arith.constant 0 : index
      %c0_18 = arith.constant 0 : index
      %56 = vector.load %arg5[%c0_17, %c0_18] : memref<32x64xf32, #tpu.memory_space<vmem>>, vector<32x64xf32>
      %cst_19 = arith.constant dense<0.000000e+00> : vector<2x64xf32>
      %57 = tpu.matmul %38, %56, %cst_19 {dimension_numbers = #tpu.dot_dimension_numbers<[1], [0], [0], [1], [0, 0, 1, 1], [], []>} : vector<2x32xf32>, vector<32x64xf32>, vector<2x64xf32> -> vector<2x64xf32>
      %58 = arith.addf %55, %57 : vector<2x64xf32>
      %c0_20 = arith.constant 0 : index
      %c0_21 = arith.constant 0 : index
      %59 = vector.load %arg6[%c0_20, %c0_21] : memref<32x64xf32, #tpu.memory_space<vmem>>, vector<32x64xf32>
      %cst_22 = arith.constant dense<0.000000e+00> : vector<2x64xf32>
      %60 = tpu.matmul %52, %59, %cst_22 {dimension_numbers = #tpu.dot_dimension_numbers<[1], [0], [0], [1], [0, 0, 1, 1], [], []>} : vector<2x32xf32>, vector<32x64xf32>, vector<2x64xf32> -> vector<2x64xf32>
      %61 = arith.addf %58, %60 : vector<2x64xf32>
      %c0_23 = arith.constant 0 : index
      %c0_24 = arith.constant 0 : index
      %62 = vector.load %arg18[%c0_23, %c0_24] : memref<2x16xf32, #tpu.memory_space<vmem>>, vector<2x16xf32>
      %c0_25 = arith.constant 0 : index
      %c0_26 = arith.constant 0 : index
      %63 = vector.load %arg7[%c0_25, %c0_26] : memref<16x64xf32, #tpu.memory_space<vmem>>, vector<16x64xf32>
      %cst_27 = arith.constant dense<0.000000e+00> : vector<2x64xf32>
      %64 = tpu.matmul %62, %63, %cst_27 {dimension_numbers = #tpu.dot_dimension_numbers<[1], [0], [0], [1], [0, 0, 1, 1], [], []>} : vector<2x16xf32>, vector<16x64xf32>, vector<2x64xf32> -> vector<2x64xf32>
      %c0_28 = arith.constant 0 : index
      %c0_29 = arith.constant 0 : index
      %65 = vector.load %arg8[%c0_28, %c0_29] : memref<1x64xf32, #tpu.memory_space<vmem>>, vector<1x64xf32>
      %66 = vector.broadcast %65 : vector<1x64xf32> to vector<2x64xf32>
      %67 = arith.addf %64, %66 : vector<2x64xf32>
      %c0_i32_30 = arith.constant 0 : i32
      %68 = arith.cmpi sgt, %6, %c0_i32_30 : i32
      %cst_31 = arith.constant 1.000000e+00 : f32
      %cst_32 = arith.constant 0.000000e+00 : f32
      %69 = arith.select %68, %cst_31, %cst_32 : f32
      %70 = vector.broadcast %69 : f32 to vector<2x64xf32>
      %71 = arith.mulf %70, %67 : vector<2x64xf32>
      %72 = arith.addf %61, %71 : vector<2x64xf32>
      %73 = vector.extract_strided_slice %72 {offsets = [0, 0], sizes = [2, 16], strides = [1, 1]} : vector<2x64xf32> to vector<2x16xf32>
      %74 = vector.extract_strided_slice %72 {offsets = [0, 16], sizes = [2, 16], strides = [1, 1]} : vector<2x64xf32> to vector<2x16xf32>
      %75 = vector.extract_strided_slice %72 {offsets = [0, 32], sizes = [2, 16], strides = [1, 1]} : vector<2x64xf32> to vector<2x16xf32>
      %76 = vector.extract_strided_slice %72 {offsets = [0, 48], sizes = [2, 16], strides = [1, 1]} : vector<2x64xf32> to vector<2x16xf32>
      %77 = math.tanh %73 : vector<2x16xf32>
      %78 = arith.negf %74 : vector<2x16xf32>
      %79 = math.exp %78 : vector<2x16xf32>
      %cst_33 = arith.constant 1.000000e+00 : f32
      %80 = vector.broadcast %cst_33 : f32 to vector<2x16xf32>
      %81 = arith.addf %80, %79 : vector<2x16xf32>
      %82 = arith.divf %80, %81 : vector<2x16xf32>
      %83 = arith.mulf %77, %82 : vector<2x16xf32>
      %84 = arith.negf %75 : vector<2x16xf32>
      %85 = math.exp %84 : vector<2x16xf32>
      %cst_34 = arith.constant 1.000000e+00 : f32
      %86 = vector.broadcast %cst_34 : f32 to vector<2x16xf32>
      %87 = arith.addf %86, %85 : vector<2x16xf32>
      %88 = arith.divf %86, %87 : vector<2x16xf32>
      %c0_35 = arith.constant 0 : index
      %c0_36 = arith.constant 0 : index
      %89 = vector.load %arg19[%c0_35, %c0_36] : memref<2x16xf32, #tpu.memory_space<vmem>>, vector<2x16xf32>
      %90 = arith.mulf %88, %89 : vector<2x16xf32>
      %91 = arith.addf %83, %90 : vector<2x16xf32>
      %92 = arith.negf %76 : vector<2x16xf32>
      %93 = math.exp %92 : vector<2x16xf32>
      %cst_37 = arith.constant 1.000000e+00 : f32
      %94 = vector.broadcast %cst_37 : f32 to vector<2x16xf32>
      %95 = arith.addf %94, %93 : vector<2x16xf32>
      %96 = arith.divf %94, %95 : vector<2x16xf32>
      %97 = math.tanh %91 : vector<2x16xf32>
      %98 = arith.mulf %96, %97 : vector<2x16xf32>
      %c0_38 = arith.constant 0 : index
      %c0_39 = arith.constant 0 : index
      %99 = vector.load %arg18[%c0_38, %c0_39] : memref<2x16xf32, #tpu.memory_space<vmem>>, vector<2x16xf32>
      tpu.vector_store %arg18[%c0_38, %c0_39], %98 {strides = array<i32>} : memref<2x16xf32, #tpu.memory_space<vmem>>, vector<2x16xf32>,
      %c0_40 = arith.constant 0 : index
      %c0_41 = arith.constant 0 : index
      %100 = vector.load %arg19[%c0_40, %c0_41] : memref<2x16xf32, #tpu.memory_space<vmem>>, vector<2x16xf32>
      tpu.vector_store %arg19[%c0_40, %c0_41], %91 {strides = array<i32>} : memref<2x16xf32, #tpu.memory_space<vmem>>, vector<2x16xf32>,
      %c0_42 = arith.constant 0 : index
      %c0_43 = arith.constant 0 : index
      %101 = vector.load %arg9[%c0_42, %c0_43] : memref<16x128xf32, #tpu.memory_space<vmem>>, vector<16x128xf32>
      %cst_44 = arith.constant dense<0.000000e+00> : vector<2x128xf32>
      %102 = tpu.matmul %98, %101, %cst_44 {dimension_numbers = #tpu.dot_dimension_numbers<[1], [0], [0], [1], [0, 0, 1, 1], [], []>} : vector<2x16xf32>, vector<16x128xf32>, vector<2x128xf32> -> vector<2x128xf32>
      %c0_45 = arith.constant 0 : index
      %c0_46 = arith.constant 0 : index
      %103 = vector.load %arg10[%c0_45, %c0_46] : memref<1x128xf32, #tpu.memory_space<vmem>>, vector<1x128xf32>
      %104 = vector.broadcast %103 : vector<1x128xf32> to vector<2x128xf32>
      %105 = arith.addf %102, %104 : vector<2x128xf32>
      %cst_47 = arith.constant dense<0xFF800000> : vector<2xf32>
      %106 = vector.multi_reduction <maximumf>, %105, %cst_47 [1] : vector<2x128xf32> to vector<2xf32>
      %107 = vector.shape_cast %106 : vector<2xf32> to vector<2x1xf32>
      %108 = vector.broadcast %107 : vector<2x1xf32> to vector<2x128xf32>
      %109 = arith.subf %105, %108 : vector<2x128xf32>
      %110 = math.exp %109 : vector<2x128xf32>
      %cst_48 = arith.constant dense<0.000000e+00> : vector<2xf32>
      %111 = vector.multi_reduction <add>, %110, %cst_48 [1] : vector<2x128xf32> to vector<2xf32>
      %112 = vector.shape_cast %111 : vector<2xf32> to vector<2x1xf32>
      %113 = math.log %112 : vector<2x1xf32>
      %114 = arith.addf %107, %113 : vector<2x1xf32>
      %115 = vector.broadcast %114 : vector<2x1xf32> to vector<2x128xf32>
      %116 = arith.subf %105, %115 : vector<2x128xf32>
      %117 = arith.index_cast %arg0 : i32 to index
      %c0_49 = arith.constant 0 : index
      %c0_50 = arith.constant 0 : index
      %118 = vector.load %arg15[%117, %c0_49, %c0_50] : memref<9x2x128xf32, #tpu.memory_space<vmem>>, vector<1x2x128xf32>
      %119 = vector.shape_cast %118 : vector<1x2x128xf32> to vector<2x128xf32>
      %120 = vector.shape_cast %116 : vector<2x128xf32> to vector<1x2x128xf32>
      tpu.vector_store %arg15[%117, %c0_49, %c0_50], %120 {strides = array<i32>} : memref<9x2x128xf32, #tpu.memory_space<vmem>>, vector<1x2x128xf32>,
      %121 = arith.index_cast %arg0 : i32 to index
      %c3 = arith.constant 3 : index
      %122 = memref.load %arg1[%121, %c3] : memref<9x13xi32, #tpu.memory_space<smem>>
      %123 = arith.index_cast %arg0 : i32 to index
      %c11 = arith.constant 11 : index
      %124 = memref.load %arg1[%123, %c11] : memref<9x13xi32, #tpu.memory_space<smem>>
      %c0_i32_51 = arith.constant 0 : i32
      %125 = arith.cmpi eq, %122, %c0_i32_51 : i32
      %126 = arith.extui %125 : i1 to i32
      %c0_i32_52 = arith.constant 0 : i32
      %127 = arith.cmpi ne, %126, %c0_i32_52 : i32
      scf.if %127 {
        %138 = vector.extract_strided_slice %24 {offsets = [0, 0], sizes = [1, 32], strides = [1, 1]} : vector<2x32xf32> to vector<1x32xf32>
        %139 = arith.index_cast %124 : i32 to index
        %c0_57 = arith.constant 0 : index
        %140 = vector.load %arg16[%139, %c0_57] : memref<22x32xf32, #tpu.memory_space<vmem>>, vector<1x32xf32>
        tpu.vector_store %arg16[%139, %c0_57], %138 {strides = array<i32>} : memref<22x32xf32, #tpu.memory_space<vmem>>, vector<1x32xf32>,
        %141 = vector.extract_strided_slice %25 {offsets = [0, 0], sizes = [1, 32], strides = [1, 1]} : vector<2x32xf32> to vector<1x32xf32>
        %142 = arith.index_cast %124 : i32 to index
        %c0_58 = arith.constant 0 : index
        %143 = vector.load %arg17[%142, %c0_58] : memref<22x32xf32, #tpu.memory_space<vmem>>, vector<1x32xf32>
        tpu.vector_store %arg17[%142, %c0_58], %141 {strides = array<i32>} : memref<22x32xf32, #tpu.memory_space<vmem>>, vector<1x32xf32>,
      } else {
      }
      %128 = arith.index_cast %arg0 : i32 to index
      %c4 = arith.constant 4 : index
      %129 = memref.load %arg1[%128, %c4] : memref<9x13xi32, #tpu.memory_space<smem>>
      %130 = arith.index_cast %arg0 : i32 to index
      %c12 = arith.constant 12 : index
      %131 = memref.load %arg1[%130, %c12] : memref<9x13xi32, #tpu.memory_space<smem>>
      %c0_i32_53 = arith.constant 0 : i32
      %132 = arith.cmpi eq, %129, %c0_i32_53 : i32
      %133 = arith.extui %132 : i1 to i32
      %c0_i32_54 = arith.constant 0 : i32
      %134 = arith.cmpi ne, %133, %c0_i32_54 : i32
      scf.if %134 {
        %138 = vector.extract_strided_slice %24 {offsets = [1, 0], sizes = [1, 32], strides = [1, 1]} : vector<2x32xf32> to vector<1x32xf32>
        %139 = arith.index_cast %131 : i32 to index
        %c0_57 = arith.constant 0 : index
        %140 = vector.load %arg16[%139, %c0_57] : memref<22x32xf32, #tpu.memory_space<vmem>>, vector<1x32xf32>
        tpu.vector_store %arg16[%139, %c0_57], %138 {strides = array<i32>} : memref<22x32xf32, #tpu.memory_space<vmem>>, vector<1x32xf32>,
        %141 = vector.extract_strided_slice %25 {offsets = [1, 0], sizes = [1, 32], strides = [1, 1]} : vector<2x32xf32> to vector<1x32xf32>
        %142 = arith.index_cast %131 : i32 to index
        %c0_58 = arith.constant 0 : index
        %143 = vector.load %arg17[%142, %c0_58] : memref<22x32xf32, #tpu.memory_space<vmem>>, vector<1x32xf32>
        tpu.vector_store %arg17[%142, %c0_58], %141 {strides = array<i32>} : memref<22x32xf32, #tpu.memory_space<vmem>>, vector<1x32xf32>,
      } else {
      }
      %c0_i32_55 = arith.constant 0 : i32
      %135 = arith.cmpi sgt, %8, %c0_i32_55 : i32
      %136 = arith.extui %135 : i1 to i32
      %c0_i32_56 = arith.constant 0 : i32
      %137 = arith.cmpi ne, %136, %c0_i32_56 : i32
      scf.if %137 {
        %c0_57 = arith.constant 0 : index
        %c0_58 = arith.constant 0 : index
        %138 = vector.load %arg11[%c0_57, %c0_58] : memref<32x160xf32, #tpu.memory_space<vmem>>, vector<32x160xf32>
        %cst_59 = arith.constant dense<0.000000e+00> : vector<2x160xf32>
        %139 = tpu.matmul %52, %138, %cst_59 {dimension_numbers = #tpu.dot_dimension_numbers<[1], [0], [0], [1], [0, 0, 1, 1], [], []>} : vector<2x32xf32>, vector<32x160xf32>, vector<2x160xf32> -> vector<2x160xf32>
        %c0_60 = arith.constant 0 : index
        %c0_61 = arith.constant 0 : index
        %140 = vector.load %arg12[%c0_60, %c0_61] : memref<32x160xf32, #tpu.memory_space<vmem>>, vector<32x160xf32>
        %cst_62 = arith.constant dense<0.000000e+00> : vector<2x160xf32>
        %141 = tpu.matmul %38, %140, %cst_62 {dimension_numbers = #tpu.dot_dimension_numbers<[1], [0], [0], [1], [0, 0, 1, 1], [], []>} : vector<2x32xf32>, vector<32x160xf32>, vector<2x160xf32> -> vector<2x160xf32>
        %142 = arith.addf %139, %141 : vector<2x160xf32>
        %c0_63 = arith.constant 0 : index
        %c0_64 = arith.constant 0 : index
        %143 = vector.load %arg13[%c0_63, %c0_64] : memref<16x160xf32, #tpu.memory_space<vmem>>, vector<16x160xf32>
        %cst_65 = arith.constant dense<0.000000e+00> : vector<2x160xf32>
        %144 = tpu.matmul %98, %143, %cst_65 {dimension_numbers = #tpu.dot_dimension_numbers<[1], [0], [0], [1], [0, 0, 1, 1], [], []>} : vector<2x16xf32>, vector<16x160xf32>, vector<2x160xf32> -> vector<2x160xf32>
        %145 = arith.addf %142, %144 : vector<2x160xf32>
        %c0_66 = arith.constant 0 : index
        %c0_67 = arith.constant 0 : index
        %146 = vector.load %arg14[%c0_66, %c0_67] : memref<1x160xf32, #tpu.memory_space<vmem>>, vector<1x160xf32>
        %147 = vector.broadcast %146 : vector<1x160xf32> to vector<2x160xf32>
        %148 = arith.addf %145, %147 : vector<2x160xf32>
        %149 = vector.extract_strided_slice %148 {offsets = [0, 0], sizes = [2, 32], strides = [1, 1]} : vector<2x160xf32> to vector<2x32xf32>
        %150 = vector.extract_strided_slice %148 {offsets = [0, 32], sizes = [2, 32], strides = [1, 1]} : vector<2x160xf32> to vector<2x32xf32>
        %151 = vector.extract_strided_slice %148 {offsets = [0, 64], sizes = [2, 32], strides = [1, 1]} : vector<2x160xf32> to vector<2x32xf32>
        %152 = vector.extract_strided_slice %148 {offsets = [0, 96], sizes = [2, 32], strides = [1, 1]} : vector<2x160xf32> to vector<2x32xf32>
        %153 = vector.extract_strided_slice %148 {offsets = [0, 128], sizes = [2, 32], strides = [1, 1]} : vector<2x160xf32> to vector<2x32xf32>
        %154 = arith.negf %150 : vector<2x32xf32>
        %155 = math.exp %154 : vector<2x32xf32>
        %cst_68 = arith.constant 1.000000e+00 : f32
        %156 = vector.broadcast %cst_68 : f32 to vector<2x32xf32>
        %157 = arith.addf %156, %155 : vector<2x32xf32>
        %158 = arith.divf %156, %157 : vector<2x32xf32>
        %159 = arith.mulf %158, %53 : vector<2x32xf32>
        %160 = arith.negf %151 : vector<2x32xf32>
        %161 = math.exp %160 : vector<2x32xf32>
        %cst_69 = arith.constant 1.000000e+00 : f32
        %162 = vector.broadcast %cst_69 : f32 to vector<2x32xf32>
        %163 = arith.addf %162, %161 : vector<2x32xf32>
        %164 = arith.divf %162, %163 : vector<2x32xf32>
        %165 = arith.mulf %164, %39 : vector<2x32xf32>
        %166 = arith.addf %159, %165 : vector<2x32xf32>
        %167 = arith.negf %149 : vector<2x32xf32>
        %168 = math.exp %167 : vector<2x32xf32>
        %cst_70 = arith.constant 1.000000e+00 : f32
        %169 = vector.broadcast %cst_70 : f32 to vector<2x32xf32>
        %170 = arith.addf %169, %168 : vector<2x32xf32>
        %171 = arith.divf %169, %170 : vector<2x32xf32>
        %172 = math.tanh %152 : vector<2x32xf32>
        %173 = arith.mulf %171, %172 : vector<2x32xf32>
        %174 = arith.addf %166, %173 : vector<2x32xf32>
        %175 = arith.negf %153 : vector<2x32xf32>
        %176 = math.exp %175 : vector<2x32xf32>
        %cst_71 = arith.constant 1.000000e+00 : f32
        %177 = vector.broadcast %cst_71 : f32 to vector<2x32xf32>
        %178 = arith.addf %177, %176 : vector<2x32xf32>
        %179 = arith.divf %177, %178 : vector<2x32xf32>
        %180 = math.tanh %174 : vector<2x32xf32>
        %181 = arith.mulf %179, %180 : vector<2x32xf32>
        %182 = arith.index_cast %arg0 : i32 to index
        %c3_72 = arith.constant 3 : index
        %183 = memref.load %arg1[%182, %c3_72] : memref<9x13xi32, #tpu.memory_space<smem>>
        %184 = arith.index_cast %arg0 : i32 to index
        %c11_73 = arith.constant 11 : index
        %185 = memref.load %arg1[%184, %c11_73] : memref<9x13xi32, #tpu.memory_space<smem>>
        %c1_i32 = arith.constant 1 : i32
        %186 = arith.cmpi eq, %183, %c1_i32 : i32
        %187 = arith.extui %186 : i1 to i32
        %c0_i32_74 = arith.constant 0 : i32
        %188 = arith.cmpi ne, %187, %c0_i32_74 : i32
        scf.if %188 {
          %196 = vector.extract_strided_slice %181 {offsets = [0, 0], sizes = [1, 32], strides = [1, 1]} : vector<2x32xf32> to vector<1x32xf32>
          %197 = arith.index_cast %185 : i32 to index
          %c0_79 = arith.constant 0 : index
          %198 = vector.load %arg16[%197, %c0_79] : memref<22x32xf32, #tpu.memory_space<vmem>>, vector<1x32xf32>
          tpu.vector_store %arg16[%197, %c0_79], %196 {strides = array<i32>} : memref<22x32xf32, #tpu.memory_space<vmem>>, vector<1x32xf32>,
          %199 = vector.extract_strided_slice %174 {offsets = [0, 0], sizes = [1, 32], strides = [1, 1]} : vector<2x32xf32> to vector<1x32xf32>
          %200 = arith.index_cast %185 : i32 to index
          %c0_80 = arith.constant 0 : index
          %201 = vector.load %arg17[%200, %c0_80] : memref<22x32xf32, #tpu.memory_space<vmem>>, vector<1x32xf32>
          tpu.vector_store %arg17[%200, %c0_80], %199 {strides = array<i32>} : memref<22x32xf32, #tpu.memory_space<vmem>>, vector<1x32xf32>,
        } else {
        }
        %189 = arith.index_cast %arg0 : i32 to index
        %c4_75 = arith.constant 4 : index
        %190 = memref.load %arg1[%189, %c4_75] : memref<9x13xi32, #tpu.memory_space<smem>>
        %191 = arith.index_cast %arg0 : i32 to index
        %c12_76 = arith.constant 12 : index
        %192 = memref.load %arg1[%191, %c12_76] : memref<9x13xi32, #tpu.memory_space<smem>>
        %c1_i32_77 = arith.constant 1 : i32
        %193 = arith.cmpi eq, %190, %c1_i32_77 : i32
        %194 = arith.extui %193 : i1 to i32
        %c0_i32_78 = arith.constant 0 : i32
        %195 = arith.cmpi ne, %194, %c0_i32_78 : i32
        scf.if %195 {
          %196 = vector.extract_strided_slice %181 {offsets = [1, 0], sizes = [1, 32], strides = [1, 1]} : vector<2x32xf32> to vector<1x32xf32>
          %197 = arith.index_cast %192 : i32 to index
          %c0_79 = arith.constant 0 : index
          %198 = vector.load %arg16[%197, %c0_79] : memref<22x32xf32, #tpu.memory_space<vmem>>, vector<1x32xf32>
          tpu.vector_store %arg16[%197, %c0_79], %196 {strides = array<i32>} : memref<22x32xf32, #tpu.memory_space<vmem>>, vector<1x32xf32>,
          %199 = vector.extract_strided_slice %174 {offsets = [1, 0], sizes = [1, 32], strides = [1, 1]} : vector<2x32xf32> to vector<1x32xf32>
          %200 = arith.index_cast %192 : i32 to index
          %c0_80 = arith.constant 0 : index
          %201 = vector.load %arg17[%200, %c0_80] : memref<22x32xf32, #tpu.memory_space<vmem>>, vector<1x32xf32>
          tpu.vector_store %arg17[%200, %c0_80], %199 {strides = array<i32>} : memref<22x32xf32, #tpu.memory_space<vmem>>, vector<1x32xf32>,
        } else {
        }
      } else {
      }
    } else {
    }
    return
  }
  func.func @transform_0(%arg0: i32, %arg1: memref<9x13xi32, #tpu.memory_space<smem>>) -> (i32, i32) {
    %c0_i32 = arith.constant 0 : i32
    %c0_i32_0 = arith.constant 0 : i32
    %c0_i32_1 = arith.constant 0 : i32
    return %c0_i32, %c0_i32_0 : i32, i32
  }
  func.func @transform_1(%arg0: i32, %arg1: memref<9x13xi32, #tpu.memory_space<smem>>) -> (i32, i32) {
    %c0_i32 = arith.constant 0 : i32
    %c0_i32_0 = arith.constant 0 : i32
    %c0_i32_1 = arith.constant 0 : i32
    return %c0_i32, %c0_i32_0 : i32, i32
  }
  func.func @transform_2(%arg0: i32, %arg1: memref<9x13xi32, #tpu.memory_space<smem>>) -> (i32, i32) {
    %c0_i32 = arith.constant 0 : i32
    %c0_i32_0 = arith.constant 0 : i32
    %c0_i32_1 = arith.constant 0 : i32
    return %c0_i32, %c0_i32_0 : i32, i32
  }
  func.func @transform_3(%arg0: i32, %arg1: memref<9x13xi32, #tpu.memory_space<smem>>) -> (i32, i32) {
    %c0_i32 = arith.constant 0 : i32
    %c0_i32_0 = arith.constant 0 : i32
    %c0_i32_1 = arith.constant 0 : i32
    return %c0_i32, %c0_i32_0 : i32, i32
  }
  func.func @transform_4(%arg0: i32, %arg1: memref<9x13xi32, #tpu.memory_space<smem>>) -> (i32, i32) {
    %c0_i32 = arith.constant 0 : i32
    %c0_i32_0 = arith.constant 0 : i32
    %c0_i32_1 = arith.constant 0 : i32
    return %c0_i32, %c0_i32_0 : i32, i32
  }
  func.func @transform_5(%arg0: i32, %arg1: memref<9x13xi32, #tpu.memory_space<smem>>) -> (i32, i32) {
    %c0_i32 = arith.constant 0 : i32
    %c0_i32_0 = arith.constant 0 : i32
    %c0_i32_1 = arith.constant 0 : i32
    return %c0_i32, %c0_i32_0 : i32, i32
  }
  func.func @transform_6(%arg0: i32, %arg1: memref<9x13xi32, #tpu.memory_space<smem>>) -> (i32, i32) {
    %c0_i32 = arith.constant 0 : i32
    %c0_i32_0 = arith.constant 0 : i32
    %c0_i32_1 = arith.constant 0 : i32
    return %c0_i32, %c0_i32_0 : i32, i32
  }
  func.func @transform_7(%arg0: i32, %arg1: memref<9x13xi32, #tpu.memory_space<smem>>) -> (i32, i32) {
    %c0_i32 = arith.constant 0 : i32
    %c0_i32_0 = arith.constant 0 : i32
    %c0_i32_1 = arith.constant 0 : i32
    return %c0_i32, %c0_i32_0 : i32, i32
  }
  func.func @transform_8(%arg0: i32, %arg1: memref<9x13xi32, #tpu.memory_space<smem>>) -> (i32, i32) {
    %c0_i32 = arith.constant 0 : i32
    %c0_i32_0 = arith.constant 0 : i32
    %c0_i32_1 = arith.constant 0 : i32
    return %c0_i32, %c0_i32_0 : i32, i32
  }
  func.func @transform_9(%arg0: i32, %arg1: memref<9x13xi32, #tpu.memory_space<smem>>) -> (i32, i32) {
    %c0_i32 = arith.constant 0 : i32
    %c0_i32_0 = arith.constant 0 : i32
    %c0_i32_1 = arith.constant 0 : i32
    return %c0_i32, %c0_i32_0 : i32, i32
  }
  func.func @transform_10(%arg0: i32, %arg1: memref<9x13xi32, #tpu.memory_space<smem>>) -> (i32, i32) {
    %c0_i32 = arith.constant 0 : i32
    %c0_i32_0 = arith.constant 0 : i32
    %c0_i32_1 = arith.constant 0 : i32
    return %c0_i32, %c0_i32_0 : i32, i32
  }
  func.func @transform_11(%arg0: i32, %arg1: memref<9x13xi32, #tpu.memory_space<smem>>) -> (i32, i32) {
    %c0_i32 = arith.constant 0 : i32
    %c0_i32_0 = arith.constant 0 : i32
    %c0_i32_1 = arith.constant 0 : i32
    return %c0_i32, %c0_i32_0 : i32, i32
  }
  func.func @transform_12(%arg0: i32, %arg1: memref<9x13xi32, #tpu.memory_space<smem>>) -> (i32, i32) {
    %c0_i32 = arith.constant 0 : i32
    %c0_i32_0 = arith.constant 0 : i32
    %c0_i32_1 = arith.constant 0 : i32
    return %c0_i32, %c0_i32_0 : i32, i32
  }
  func.func @transform_13(%arg0: i32, %arg1: memref<9x13xi32, #tpu.memory_space<smem>>) -> (i32, i32, i32) {
    %c0_i32 = arith.constant 0 : i32
    %c0_i32_0 = arith.constant 0 : i32
    %c0_i32_1 = arith.constant 0 : i32
    %c0_i32_2 = arith.constant 0 : i32
    return %c0_i32, %c0_i32_0, %c0_i32_1 : i32, i32, i32
  }
  func.func @transform_14(%arg0: i32, %arg1: memref<9x13xi32, #tpu.memory_space<smem>>) -> (i32, i32) {
    %c0_i32 = arith.constant 0 : i32
    %c0_i32_0 = arith.constant 0 : i32
    %c0_i32_1 = arith.constant 0 : i32
    return %c0_i32, %c0_i32_0 : i32, i32
  }
  func.func @transform_15(%arg0: i32, %arg1: memref<9x13xi32, #tpu.memory_space<smem>>) -> (i32, i32) {
    %c0_i32 = arith.constant 0 : i32
    %c0_i32_0 = arith.constant 0 : i32
    %c0_i32_1 = arith.constant 0 : i32
    return %c0_i32, %c0_i32_0 : i32, i32
  }
}

</mosaic_0001>

<bundles_post_ra>
// kernel: tpu_custom_call.1
= control target key start
LH: loop header
LB: loop body
LE: loop exit
PB: predicated region body
PF: predicated region fallthrough
CT: control target
= control target key end

     0   :  { %s3024_s0 = inlined_call_operand.hbm [shape: s32[9,13], index: 0, kind: input, shape index: {}]   ;;  %s3025_s1 = inlined_call_operand.hbm [shape: f32[18,32], index: 1, kind: input, shape index: {}]   ;;  %s3026_s2 = inlined_call_operand.hbm [shape: f32[18,32], index: 2, kind: input, shape index: {}]   ;;  %s3027_s3 = inlined_call_operand.hbm [shape: f32[32,64], index: 3, kind: input, shape index: {}]   ;;  %s3028_s4 = inlined_call_operand.hbm [shape: f32[32,64], index: 4, kind: input, shape index: {}]   ;;  %s3029_s5 = inlined_call_operand.hbm [shape: f32[32,64], index: 5, kind: input, shape index: {}]   ;;  %s3030_s6 = inlined_call_operand.hbm [shape: f32[16,64], index: 6, kind: input, shape index: {}]   ;;  %s3031_s7 = inlined_call_operand.vmem [shape: f32[1,64], index: 7, kind: input, shape index: {}]   ;;  %s3032_s8 = inlined_call_operand.hbm [shape: f32[16,128], index: 8, kind: input, shape index: {}]   ;;  %s3033_s9 = inlined_call_operand.vmem [shape: f32[1,128], index: 9, kind: input, shape index: {}]   ;;  %s3034_s10 = inlined_call_operand.hbm [shape: f32[32,160], index: 10, kind: input, shape index: {}]   ;;  %s3035_s11 = inlined_call_operand.hbm [shape: f32[32,160], index: 11, kind: input, shape index: {}]   ;;  %s3036_s12 = inlined_call_operand.vmem [shape: f32[16,160], index: 12, kind: input, shape index: {}]   ;;  %s3037_s13 = inlined_call_operand.vmem [shape: f32[1,160], index: 13, kind: input, shape index: {}]   ;;  %s3038_s14 = inlined_call_operand.hbm [shape: f32[9,2,128], index: 14, kind: output, shape index: {0}]   ;;  %s3039_s15 = inlined_call_operand.hbm [shape: f32[22,32], index: 15, kind: output, shape index: {1}]   ;;  %s3040_s16 = inlined_call_operand.hbm [shape: f32[22,32], index: 16, kind: output, shape index: {2}]  }
   0x1   :  { %3053 = sst [smem:[#allocation34_spill]] %s3024_s0 }
   0x2   :  { %3054 = sst [smem:[#allocation35_spill]] %s3026_s2  ;;  %s3059_s23 = sld [smem:[#allocation34_spill]] }
   0x3   :  { %3055 = sst [smem:[#allocation36_spill]] %s3033_s9 }
   0x4   :  { %3056 = sst [smem:[#allocation37_spill]] %s3038_s14 }
   0x5   :  { %3057 = sst [smem:[#allocation38_spill]] %s3039_s15 }
   0x6   :  { %3058 = sst [smem:[#allocation39_spill]] %s3040_s16 }
   0x8   :  { %s2025_s9 = scalar_lea.hbm %s3059_s23, 256 }
   0x9   :  { %p2026_p0 = scmp.ne.s32.totalorder %s3059_s23, %s2025_s9  ;;  %p2029_p1 = scmp.lt.u32.totalorder %s2025_s9, %s3059_s23 }
   0xb   :  { %p2031_p2 = pnand %p2029_p1, %p2026_p0 }
   0xd   :  { %2034 = shalt.err (!%p2031_p2)  }
   0xe   :  { %s2403_s28 = smov [#allocation5]  }
   0xf   :  { %23 = dma.hbm_to_smem %s3059_s23, 256, %s2403_s28, [#allocation4] }
  0x10   :  { %2369 = dma.done.wait [#allocation4], 256 }
  0x11   :  { %2370 = vsyncadd [#allocation4], 4294967040 }
  0x12   :  { %25 = sfence }
  0x13   :  { %26 = vsyncpa [#allocation7], 0 }
  0x14   :  { %27 = vsyncpa [#allocation10], 0 }
  0x15   :  { %28 = vsyncpa [#allocation13], 0 }
  0x16   :  { %29 = vsyncpa [#allocation16], 0 }
  0x17   :  { %30 = vsyncpa [#allocation19], 0 }
  0x18   :  { %31 = vsyncpa [#allocation8], 0 }
  0x19   :  { %32 = vsyncpa [#allocation23], 0  ;;  %s2536_s0 = smov 0  }
  0x1a LB: > { %3060 = sst [smem:[#allocation33_spill]] %s2401_s0  ;;  %s2542_s9 = sadd.s32 4294967295, %s2401_s0   ;;  %s2401_s0 = sphi %s2536_s0, %s38_s0  }
  0x1b   : > { %p1691_p3 = scmp.ge.s32.totalorder %s2401_s0, 1  ;;  %p379_p4 = scmp.lt.s32.totalorder %s2401_s0, 10 }
  0x1c   : > { %p3046_p6 = scmp.eq.s32.totalorder %s2542_s9, 0  ;;  %s2404_s18 = smov [#allocation9]  }
  0x1d   : > { %p2548_p7 = pnand %p1691_p3, %p379_p4  ;;  %s404_s19 = sshll.u32 %s2404_s18, 4  ;;  %s2552_s19 = int_to_ptr.vmem [resolvable:$true] %s404_s19 }
  0x1e   : > { %s2405_s20 = smov [#allocation12]   ;;  %s2406_s23 = smov [#allocation15]  }
  0x1f   : > { %s3061_s17 = scalar_select %p2548_p7, 1, 0 }
  0x20   : > { %p1905_p8 = pneg %p2548_p7  ;;  %s430_s21 = sshll.u32 %s2405_s20, 4  ;;  %s2556_s21 = int_to_ptr.vmem [resolvable:$true] %s430_s21 }
  0x21   : > { %s456_s24 = sshll.u32 %s2406_s23, 4  ;;  %s2407_s25 = smov [#allocation18]   ;;  %s2564_s24 = int_to_ptr.vmem [resolvable:$true] %s456_s24 }
  0x22   : > { %p2560_p9 = pnand %p3046_p6, %p1905_p8  ;;  %s2566_s26 = sshll.u32 %s2407_s25, 4  ;;  %s489_s26 = int_to_ptr.vmem [resolvable:$true] %s2566_s26 }
  0x23   : > { %s3063_s2 = sld [smem:[#allocation35_spill]] }
  0x24   : > { %p2576_p11 = pneg %p2560_p9 }
  0x29   : > { %s2035_s29 = scalar_lea.hbm %s3063_s2, 384 }
  0x2a   : > { %p2036_p10 = scmp.ne.s32.totalorder %s3063_s2, %s2035_s29  ;;  %p2042_p0 = scmp.lt.u32.totalorder %s2035_s29, %s3063_s2 }
  0x2c   : > { %p2038_p12 = pnand %p2576_p11, %p2036_p10 }
  0x2e   : > { %p2039_p13 = pneg %p2038_p12 }
  0x30   : > { %p2044_p1 = pnand %p2042_p0, %p2039_p13 }
  0x32   : > { %2047 = shalt.err (!%p2044_p1)
}
  0x33   : > { %s2048_s27 = scalar_lea.vmem %s2552_s19, 384  ;;  %p2056_p8 = scmp.lt.s32.totalorder %s2552_s19, %s2552_s19 }
  0x34   : > { %p2049_p2 = scmp.ne.s32.totalorder %s2552_s19, %s2048_s27  ;;  %p2057_p5 = scmp.lt.s32.totalorder %s2048_s27, %s2048_s27 }
  0x36   : > { %p2051_p3 = pnand %p2049_p2, %p2576_p11  ;;  %p2058_p10 = por %p2057_p5, %p2056_p8 }
  0x38   : > { %p2052_p4 = pneg %p2051_p3 }
  0x3a   : > { %p2059_p12 = pnand %p2058_p10, %p2052_p4 }
  0x3c   : > { %2062 = shalt.err (!%p2059_p12)
}
  0x3d   : > { %s3048_s28 = smov 128   ;;  %s3050_s29 = smov 8  }
  0x3e   : > { %1911 = dma.hbm_to_vmem [thread:$0]  (!%p2560_p9), %s3063_s2, 384, %s2552_s19, [#allocation10], %s3048_s28, %s3048_s28, %s3050_s29  }
  0x3f   : > { %s2063_s27 = scalar_lea.hbm %s3028_s4, 512 }
  0x40   : > { %p2064_p5 = scmp.ne.s32.totalorder %s3028_s4, %s2063_s27  ;;  %p2070_p1 = scmp.lt.u32.totalorder %s2063_s27, %s3028_s4 }
  0x42   : > { %p2066_p13 = pnand %p2064_p5, %p2576_p11 }
  0x44   : > { %p2067_p0 = pneg %p2066_p13 }
  0x46   : > { %p2072_p2 = pnand %p2070_p1, %p2067_p0 }
  0x48   : > { %2075 = shalt.err (!%p2072_p2)
}
  0x49   : > { %s2076_s19 = scalar_lea.vmem %s2556_s21, 512  ;;  %p2084_p10 = scmp.lt.s32.totalorder %s2556_s21, %s2556_s21 }
  0x4a   : > { %p2077_p3 = scmp.ne.s32.totalorder %s2556_s21, %s2076_s19  ;;  %p2085_p12 = scmp.lt.s32.totalorder %s2076_s19, %s2076_s19 }
  0x4c   : > { %p2079_p4 = pnand %p2077_p3, %p2576_p11  ;;  %p2086_p5 = por %p2085_p12, %p2084_p10 }
  0x4e   : > { %p2080_p8 = pneg %p2079_p4 }
  0x50   : > { %p2087_p13 = pnand %p2086_p5, %p2080_p8 }
  0x52   : > { %2090 = shalt.err (!%p2087_p13)
}
  0x53   : > { %1917 = dma.hbm_to_vmem [thread:$0]  (!%p2560_p9), %s3028_s4, 512, %s2556_s21, [#allocation13], %s3048_s28, %s3048_s28, %s3050_s29  }
  0x54   : > { %s2091_s30 = scalar_lea.hbm %s3030_s6, 256 }
  0x55   : > { %p2092_p0 = scmp.ne.s32.totalorder %s3030_s6, %s2091_s30  ;;  %p2098_p3 = scmp.lt.u32.totalorder %s2091_s30, %s3030_s6 }
  0x57   : > { %p2094_p1 = pnand %p2092_p0, %p2576_p11 }
  0x59   : > { %p2095_p2 = pneg %p2094_p1 }
  0x5b   : > { %p2100_p4 = pnand %p2098_p3, %p2095_p2 }
  0x5d   : > { %2103 = shalt.err (!%p2100_p4)
}
  0x5e   : > { %s2104_s21 = scalar_lea.vmem %s2564_s24, 256  ;;  %p2112_p5 = scmp.lt.s32.totalorder %s2564_s24, %s2564_s24 }
  0x5f   : > { %p2105_p8 = scmp.ne.s32.totalorder %s2564_s24, %s2104_s21  ;;  %p2113_p13 = scmp.lt.s32.totalorder %s2104_s21, %s2104_s21 }
  0x61   : > { %p2107_p10 = pnand %p2105_p8, %p2576_p11  ;;  %p2114_p0 = por %p2113_p13, %p2112_p5 }
  0x63   : > { %p2108_p12 = pneg %p2107_p10 }
  0x65   : > { %p2115_p1 = pnand %p2114_p0, %p2108_p12 }
  0x67   : > { %2118 = shalt.err (!%p2115_p1)
}
  0x68   : > { %1923 = dma.hbm_to_vmem [thread:$0]  (!%p2560_p9), %s3030_s6, 256, %s2564_s24, [#allocation16], %s3048_s28, %s3048_s28, %s3050_s29  }
  0x69   : > { %s2119_s0 = scalar_lea.hbm %s3034_s10, 1024 }
  0x6a   : > { %p2120_p2 = scmp.ne.s32.totalorder %s3034_s10, %s2119_s0  ;;  %p2126_p8 = scmp.lt.u32.totalorder %s2119_s0, %s3034_s10 }
  0x6c   : > { %p2122_p3 = pnand %p2120_p2, %p2576_p11 }
  0x6e   : > { %p2123_p4 = pneg %p2122_p3 }
  0x70   : > { %p2128_p10 = pnand %p2126_p8, %p2123_p4 }
  0x72   : > { %2131 = shalt.err (!%p2128_p10)
}
  0x73   : > { %s2132_s27 = scalar_lea.vmem %s489_s26, 1024  ;;  %p2140_p0 = scmp.lt.s32.totalorder %s489_s26, %s489_s26 }
  0x74   : > { %p2133_p12 = scmp.ne.s32.totalorder %s489_s26, %s2132_s27  ;;  %p2141_p1 = scmp.lt.s32.totalorder %s2132_s27, %s2132_s27 }
  0x76   : > { %p2135_p5 = pnand %p2133_p12, %p2576_p11  ;;  %p2142_p6 = por %p2141_p1, %p2140_p0 }
  0x78   : > { %p2136_p13 = pneg %p2135_p5 }
  0x7a   : > { %p2143_p7 = pnand %p2142_p6, %p2136_p13 }
  0x7c   : > { %2146 = shalt.err (!%p2143_p7)
}
  0x7d   : > { %s3052_s24 = smov 256   ;;  %s2411_s21 = smov 16  }
  0x7e   : > { %1929 = dma.hbm_to_vmem [thread:$0]  (!%p2560_p9), %s3034_s10, 1024, %s489_s26, [#allocation19], %s3052_s24, %s3052_s24, %s2411_s21  }
  0x7f   : > { %s2412_s15 = smov [#allocation6]   ;;  %s2413_s0 = smov [#allocation11]  }
  0x80   : > { %s391_s16 = sshll.u32 %s2412_s15, 4  ;;  %s417_s30 = sshll.u32 %s2413_s0, 4  ;;  %s392_s16 = int_to_ptr.vmem [resolvable:$true] %s391_s16  ;;  %s418_s30 = int_to_ptr.vmem [resolvable:$true] %s417_s30 }
  0x81   : > { %s2147_s25 = scalar_lea.hbm %s3025_s1, 384 }
  0x82   : > { %p2148_p6 = scmp.ne.s32.totalorder %s3025_s1, %s2147_s25  ;;  %p2154_p3 = scmp.lt.u32.totalorder %s2147_s25, %s3025_s1 }
  0x84   : > { %p2150_p7 = pnand %p2148_p6, %p2576_p11 }
  0x86   : > { %p2151_p2 = pneg %p2150_p7 }
  0x88   : > { %p2156_p4 = pnand %p2154_p3, %p2151_p2 }
  0x8a   : > { %2159 = shalt.err (!%p2156_p4)
}
  0x8b   : > { %s2160_s26 = scalar_lea.vmem %s392_s16, 384  ;;  %p2168_p5 = scmp.lt.s32.totalorder %s392_s16, %s392_s16 }
  0x8c   : > { %p2161_p8 = scmp.ne.s32.totalorder %s392_s16, %s2160_s26  ;;  %p2169_p13 = scmp.lt.s32.totalorder %s2160_s26, %s2160_s26 }
  0x8e   : > { %p2163_p10 = pnand %p2161_p8, %p2576_p11  ;;  %p2170_p0 = por %p2169_p13, %p2168_p5 }
  0x90   : > { %p2164_p12 = pneg %p2163_p10 }
  0x92   : > { %p2171_p1 = pnand %p2170_p0, %p2164_p12 }
  0x94   : > { %2174 = shalt.err (!%p2171_p1)
}
  0x95   : > { %s3065_s28 = smov 8   ;;  %s3066_s19 = smov 128  }
  0x96   : > { %1908 = dma.hbm_to_vmem [thread:$0]  (!%p2560_p9), %s3025_s1, 384, %s392_s16, [#allocation7], %s3066_s19, %s3066_s19, %s3065_s28  }
  0x97   : > { %s2175_s0 = scalar_lea.hbm %s3027_s3, 512 }
  0x98   : > { %p2176_p6 = scmp.ne.s32.totalorder %s3027_s3, %s2175_s0  ;;  %p2182_p3 = scmp.lt.u32.totalorder %s2175_s0, %s3027_s3 }
  0x9a   : > { %p2178_p7 = pnand %p2176_p6, %p2576_p11 }
  0x9c   : > { %p2179_p2 = pneg %p2178_p7 }
  0x9e   : > { %p2184_p4 = pnand %p2182_p3, %p2179_p2 }
  0xa0   : > { %2187 = shalt.err (!%p2184_p4)
}
  0xa1   : > { %s2188_s26 = scalar_lea.vmem %s418_s30, 512  ;;  %p2196_p5 = scmp.lt.s32.totalorder %s418_s30, %s418_s30 }
  0xa2   : > { %p2189_p8 = scmp.ne.s32.totalorder %s418_s30, %s2188_s26  ;;  %p2197_p13 = scmp.lt.s32.totalorder %s2188_s26, %s2188_s26 }
  0xa4   : > { %p2191_p10 = pnand %p2189_p8, %p2576_p11  ;;  %p2198_p0 = por %p2197_p13, %p2196_p5 }
  0xa6   : > { %p2192_p12 = pneg %p2191_p10 }
  0xa8   : > { %p2199_p1 = pnand %p2198_p0, %p2192_p12 }
  0xaa   : > { %2202 = shalt.err (!%p2199_p1)
}
  0xab   : > { %1914 = dma.hbm_to_vmem [thread:$0]  (!%p2560_p9), %s3027_s3, 512, %s418_s30, [#allocation10], %s3066_s19, %s3066_s19, %s3065_s28  }
  0xac   : > { %s2414_s29 = smov [#allocation14]   ;;  %s2415_s15 = smov [#allocation17]  }
  0xad   : > { %s443_s14 = sshll.u32 %s2414_s29, 4  ;;  %s472_s0 = sshll.u32 %s2415_s15, 4  ;;  %s444_s14 = int_to_ptr.vmem [resolvable:$true] %s443_s14  ;;  %s473_s0 = int_to_ptr.vmem [resolvable:$true] %s472_s0 }
  0xae   : > { %s2203_s25 = scalar_lea.hbm %s3029_s5, 512 }
  0xaf   : > { %p2204_p6 = scmp.ne.s32.totalorder %s3029_s5, %s2203_s25  ;;  %p2210_p3 = scmp.lt.u32.totalorder %s2203_s25, %s3029_s5 }
  0xb1   : > { %p2206_p7 = pnand %p2204_p6, %p2576_p11 }
  0xb3   : > { %p2207_p2 = pneg %p2206_p7 }
  0xb5   : > { %p2212_p4 = pnand %p2210_p3, %p2207_p2 }
  0xb7   : > { %2215 = shalt.err (!%p2212_p4)
}
  0xb8   : > { %s2216_s30 = scalar_lea.vmem %s444_s14, 512  ;;  %p2224_p5 = scmp.lt.s32.totalorder %s444_s14, %s444_s14 }
  0xb9   : > { %p2217_p8 = scmp.ne.s32.totalorder %s444_s14, %s2216_s30  ;;  %p2225_p13 = scmp.lt.s32.totalorder %s2216_s30, %s2216_s30 }
  0xbb   : > { %p2219_p10 = pnand %p2217_p8, %p2576_p11  ;;  %p2226_p0 = por %p2225_p13, %p2224_p5 }
  0xbd   : > { %p2220_p12 = pneg %p2219_p10 }
  0xbf   : > { %p2227_p1 = pnand %p2226_p0, %p2220_p12 }
  0xc1   : > { %2230 = shalt.err (!%p2227_p1)
}
  0xc2   : > { %1920 = dma.hbm_to_vmem [thread:$0]  (!%p2560_p9), %s3029_s5, 512, %s444_s14, [#allocation13], %s3066_s19, %s3066_s19, %s3065_s28  }
  0xc3   : > { %s2231_s18 = scalar_lea.hbm %s3032_s8, 256 }
  0xc4   : > { %p2232_p6 = scmp.ne.s32.totalorder %s3032_s8, %s2231_s18  ;;  %p2238_p3 = scmp.lt.u32.totalorder %s2231_s18, %s3032_s8 }
  0xc6   : > { %p2234_p7 = pnand %p2232_p6, %p2576_p11 }
  0xc8   : > { %p2235_p2 = pneg %p2234_p7 }
  0xca   : > { %p2240_p4 = pnand %p2238_p3, %p2235_p2 }
  0xcc   : > { %2243 = shalt.err (!%p2240_p4)
}
  0xcd   : > { %s2244_s16 = scalar_lea.vmem %s473_s0, 256  ;;  %p2252_p5 = scmp.lt.s32.totalorder %s473_s0, %s473_s0 }
  0xce   : > { %p2245_p8 = scmp.ne.s32.totalorder %s473_s0, %s2244_s16  ;;  %p2253_p13 = scmp.lt.s32.totalorder %s2244_s16, %s2244_s16 }
  0xd0   : > { %p2247_p10 = pnand %p2245_p8, %p2576_p11  ;;  %p2254_p0 = por %p2253_p13, %p2252_p5 }
  0xd2   : > { %p2248_p12 = pneg %p2247_p10 }
  0xd4   : > { %p2255_p1 = pnand %p2254_p0, %p2248_p12 }
  0xd6   : > { %2258 = shalt.err (!%p2255_p1)
}
  0xd7   : > { %1926 = dma.hbm_to_vmem [thread:$0]  (!%p2560_p9), %s3032_s8, 256, %s473_s0, [#allocation16], %s3066_s19, %s3066_s19, %s3065_s28  }
  0xd8   : > { %s2416_s24 = smov [#allocation20]   ;;  %s2259_s18 = scalar_lea.hbm %s3035_s11, 1024 }
  0xd9   : > { %s501_s2 = sshll.u32 %s2416_s24, 4  ;;  %p2260_p6 = scmp.ne.s32.totalorder %s3035_s11, %s2259_s18  ;;  %s502_s2 = int_to_ptr.vmem [resolvable:$true] %s501_s2 }
  0xda   : > { %p2266_p3 = scmp.lt.u32.totalorder %s2259_s18, %s3035_s11 }
  0xdb   : > { %p2262_p7 = pnand %p2260_p6, %p2576_p11 }
  0xdd   : > { %p2263_p2 = pneg %p2262_p7 }
  0xdf   : > { %p2268_p4 = pnand %p2266_p3, %p2263_p2 }
  0xe1   : > { %2271 = shalt.err (!%p2268_p4)
}
  0xe2   : > { %s2272_s28 = scalar_lea.vmem %s502_s2, 1024  ;;  %p2280_p5 = scmp.lt.s32.totalorder %s502_s2, %s502_s2 }
  0xe3   : > { %p2273_p8 = scmp.ne.s32.totalorder %s502_s2, %s2272_s28  ;;  %p2281_p13 = scmp.lt.s32.totalorder %s2272_s28, %s2272_s28 }
  0xe5   : > { %p2275_p10 = pnand %p2273_p8, %p2576_p11  ;;  %p2282_p0 = por %p2281_p13, %p2280_p5 }
  0xe7   : > { %p2276_p12 = pneg %p2275_p10 }
  0xe9   : > { %p2283_p1 = pnand %p2282_p0, %p2276_p12 }
  0xeb   : > { %2286 = shalt.err (!%p2283_p1)
}
  0xec   : > { %s3067_s19 = smov 256   ;;  %p3068_p6 = scmp.ne.s32.totalorder %s3061_s17, 0 }
  0xed   : > { %1932 = dma.hbm_to_vmem [thread:$0]  (!%p2560_p9), %s3035_s11, 1024, %s502_s2, [#allocation19], %s3067_s19, %s3067_s19, %s2411_s21  }
  0xee   : > { %523 = sbr.rel (%p3068_p6) target bundleno = 2283 (0x8eb), region = 72  ;;  %p3069_p11 = scmp.eq.s32.totalorder (!%p3068_p6), %s2542_s9, 0 }
  0xf5   : > { %2372 = dma.done.wait (%p3069_p11), [#allocation7], 384   ;;  %p3070_p7 = pmov %p3069_p11 }
  0xf7   : > { %2374 = vsyncadd (%p3070_p7), [#allocation7], 4294966912  ;;  %p3071_p2 = pmov %p3070_p7 }
  0xf9   : > { %2376 = dma.done.wait (%p3071_p2), [#allocation10], 896   ;;  %p3072_p3 = pmov %p3071_p2 }
  0xfa   : > { %p3073_p4 = pmov %p3071_p2 }
  0xfb   : > { %2378 = vsyncadd (%p3072_p3), [#allocation10], 4294966400 }
  0xfc   : > { %2380 = dma.done.wait (%p3073_p4), [#allocation13], 1024   ;;  %p3074_p9 = pmov %p3071_p2 }
  0xfd   : > { %p3075_p8 = pmov %p3071_p2 }
  0xfe   : > { %2382 = vsyncadd (%p3074_p9), [#allocation13], 4294966272 }
  0xff   : > { %2384 = dma.done.wait (%p3075_p8), [#allocation16], 512   ;;  %p3076_p10 = pmov %p3071_p2 }
 0x100   : > { %p3077_p12 = pmov %p3071_p2 }
 0x101   : > { %2386 = vsyncadd (%p3076_p10), [#allocation16], 4294966784 }
 0x102   : > { %2388 = dma.done.wait (%p3077_p12), [#allocation19], 2048   ;;  %p3078_p5 = pmov %p3071_p2 }
 0x103   : > { %p3079_p13 = scmp.ne.s32.totalorder %s2542_s9, 0 }
 0x104   : > { %2390 = vsyncadd (%p3078_p5), [#allocation19], 4294965248  ;;  %vm597_vm0 = vcmask (!%p3079_p13), 261120   ;;  %vm600_vm1 = vcmask (!%p3079_p13), 259072   ;;  %vm605_vm2 = vcmask (!%p3079_p13), 123904   ;;  %v2417_v0 = vmov (!%p3079_p13), 0.0  }
 0x105   : > { %596 = sbr.rel (%p3079_p13) target bundleno = 270 (0x10e), region = 112  ;;  %598 = vst.msk [vmem:[#allocation22] sm:$0xff] (!%p3079_p13), %vm597_vm0, %v2417_v0  ;;  %599 = vst.msk [vmem:[#allocation22 + $0x8] sm:$0xff] (!%p3079_p13), %vm597_vm0, %v2417_v0 }
 0x106   : > { %602 = vst.msk [vmem:[#allocation24] sm:$0xff] (!%p3079_p13), %vm597_vm0, %v2417_v0  ;;  %603 = vst.msk [vmem:[#allocation24 + $0x8] sm:$0xff] (!%p3079_p13), %vm597_vm0, %v2417_v0 }
 0x107   : > { %608 = vst [vmem:[#allocation21] sm:$0x3] (!%p3079_p13), %v2417_v0  ;;  %609 = vst [vmem:[#allocation21 + $0x2] sm:$0x3] (!%p3079_p13), %v2417_v0 }
 0x108   : > { %610 = vst [vmem:[#allocation21 + $0x4] sm:$0x3] (!%p3079_p13), %v2417_v0  ;;  %611 = vst [vmem:[#allocation21 + $0x6] sm:$0x3] (!%p3079_p13), %v2417_v0 }
 0x109   : > { %612 = vst [vmem:[#allocation21 + $0x8] sm:$0x3] (!%p3079_p13), %v2417_v0  ;;  %613 = vst [vmem:[#allocation21 + $0xa] sm:$0x3] (!%p3079_p13), %v2417_v0 }
 0x10a   : > { %614 = vst [vmem:[#allocation21 + $0xc] sm:$0x3] (!%p3079_p13), %v2417_v0  ;;  %615 = vst [vmem:[#allocation21 + $0xe] sm:$0x3] (!%p3079_p13), %v2417_v0 }
 0x10b   : > { %616 = vst [vmem:[#allocation21 + $0x10] sm:$0x3] (!%p3079_p13), %v2417_v0  ;;  %601 = vst.msk [vmem:[#allocation22 + $0x10] sm:$0x3f] (!%p3079_p13), %vm600_vm1, %v2417_v0 }
 0x10c   : > { %604 = vst.msk [vmem:[#allocation24 + $0x10] sm:$0x3f] %vm600_vm1, %v2417_v0 }
 0x10d   : > { %606 = vst.msk [vmem:[#allocation2] sm:$0x3] %vm605_vm2, %v2417_v0  ;;  %607 = vst.msk [vmem:[#allocation3] sm:$0x3] %vm605_vm2, %v2417_v0 }
 0x10e PF: > { %s2808_s17 = sshll.u32 %s2542_s9, 7 }
 0x10f   : > { %s618_s22 = sld [smem:[#allocation5 + %s2808_s17]]  ;;  %s619_s20 = sadd.s32 1, %s2808_s17 }
 0x110   : > { %s2812_s21 = sld [smem:[#allocation5 + %s619_s20]]  ;;  %s621_s14 = sadd.s32 2, %s2808_s17 }
 0x111   : > { %s2815_s30 = sld [smem:[#allocation5 + %s621_s14]] }
 0x115   : > { %p1713_p0 = scmp.le.s32.totalorder %s618_s22, 0 }
 0x116   : > { %v692_v1 = vld [vmem:[#allocation12] sm:$0xff] (!%p1713_p0)  ;;  %v693_v2 = vld [vmem:[#allocation12 + $0x8] sm:$0xff] (!%p1713_p0)  ;;  %v2418_v4 = vmov (!%p1713_p0), 0.0|0.0   ;;  %v694_v7 = vld [vmem:[#allocation12 + $0x10] sm:$0xff] (!%p1713_p0)  ;;  %s648_s24 = sadd.s32 (!%p1713_p0), 7, %s2808_s17  ;;  %s654_s2 = sadd.s32 (!%p1713_p0), 8, %s2808_s17 }
 0x117   : > { %626 = sbr.rel (%p1713_p0) target bundleno = 2190 (0x88e), region = 116  ;;  %v688_v3 = vld [vmem:[#allocation11] sm:$0xff] (!%p1713_p0)  ;;  %1809 = vmatprep.subr.bf16.mxu0 (!%p1713_p0), %v2418_v4  ;;  %v1810_v5 = vpack.c.bf16 (!%p1713_p0), %v693_v2, %v692_v1  ;;  %1815 = vmatprep.subr.bf16.mxu1 (!%p1713_p0), %v2418_v4  ;;  %v689_v6 = vld [vmem:[#allocation11 + $0x8] sm:$0xff] (!%p1713_p0)  ;;  %v695_v8 = vld [vmem:[#allocation12 + $0x18] sm:$0xff] (!%p1713_p0)  ;;  %vm2419_vm3 = vmmov (!%p1713_p0), 0   ;;  %v2420_v12 = vmov (!%p1713_p0), 0.0  }
 0x118   : > { %v1816_v9 = vpack.c.bf16 (!%p1713_p0), %v689_v6, %v688_v3  ;;  %v690_v10 = vld [vmem:[#allocation11 + $0x10] sm:$0xff] (!%p1713_p0)  ;;  %v691_v11 = vld [vmem:[#allocation11 + $0x18] sm:$0xff] (!%p1713_p0)  ;;  %1770 = vmatprep.mubr.msk.f32.mxu0 (!%p1713_p0), %vm2419_vm3, %v2420_v12  ;;  %1781 = vmatprep.mubr.msk.f32.mxu1 (!%p1713_p0), %vm2419_vm3, %v2420_v12  ;;  %s649_s29 = sld [smem:[#allocation5 + %s648_s24]] (!%p1713_p0)  ;;  %v1813_v13 = vpack.c.bf16 (!%p1713_p0), %v695_v8, %v694_v7  ;;  %s627_s18 = sadd.s32 (!%p1713_p0), 5, %s2808_s17  ;;  %v1022_v15 = vld [vmem:[#allocation3] sm:$0x3] (!%p1713_p0) }
 0x119   : > { %s2825_s15 = sld [smem:[#allocation5 + %s654_s2]] (!%p1713_p0)  ;;  %1811 = vmatpush3.bf16.msra.mxu0 (!%p1713_p0), %v1810_v5  ;;  %s633_s23 = sadd.s32 (!%p1713_p0), 6, %s2808_s17  ;;  %v1819_v14 = vpack.c.bf16 (!%p1713_p0), %v691_v11, %v690_v10  ;;  %vm642_vm4 = vcmask (!%p1713_p0), 1040384   ;;  %v843_v16 = vld [vmem:[#allocation14] sm:$0xff] (!%p1713_p0)  ;;  %v844_v17 = vld [vmem:[#allocation14 + $0x8] sm:$0xff] (!%p1713_p0)  ;;  %vm696_vm5 = vcmask (!%p1713_p0), 261120  }
 0x11a   : > { %1817 = vmatpush3.bf16.msra.mxu1 (!%p1713_p0), %v1816_v9  ;;  %1812 = vmatprep.subr.bf16.mxu0 (!%p1713_p0), %v2418_v4  ;;  %s2830_s25 = sld [smem:[#allocation5 + %s627_s18]] (!%p1713_p0)  ;;  %s668_s26 = sadd.s32 (!%p1713_p0), 9, %s2808_s17  ;;  %v922_v20 = vld [vmem:[#allocation15] sm:$0xff] (!%p1713_p0)  ;;  %v1822_v25 = vpack.c.bf16 (!%p1713_p0), %v844_v17, %v843_v16  ;;  %v923_v26 = vld [vmem:[#allocation15 + $0x8] sm:$0xff] (!%p1713_p0)  ;;  %v845_v27 = vld [vmem:[#allocation14 + $0x10] sm:$0xff] (!%p1713_p0)  ;;  %vm931_vm6 = vcmask (!%p1713_p0), 130048  }
 0x11b   : > { %s2832_s27 = sld [smem:[#allocation5 + %s633_s23]] (!%p1713_p0)  ;;  %1818 = vmatprep.subr.bf16.mxu1 (!%p1713_p0), %v2418_v4  ;;  %s674_s28 = sadd.s32 (!%p1713_p0), 10, %s2808_s17  ;;  %v846_v28 = vld [vmem:[#allocation14 + $0x18] sm:$0xff] (!%p1713_p0)  ;;  %v1828_v37 = vpack.c.bf16 (!%p1713_p0), %v923_v26, %v922_v20  ;;  %v921_v47 = vld [vmem:[#allocation2] sm:$0x3] (!%p1713_p0)  ;;  %vm1043_vm7 = vcmask (!%p1713_p0), 123904  }
 0x11c   : > { %s2837_s19 = sld [smem:[#allocation5 + %s668_s26]] (!%p1713_p0)  ;;  %s2421_s20 = smov (!%p1713_p0), 32   ;;  %v1825_v38 = vpack.c.bf16 (!%p1713_p0), %v846_v28, %v845_v27  ;;  %v1717_v55 = vld [vmem:[%s3031_s7] ss:$0 sm:$0xff] (!%p1713_p0)  ;;  %vm1127_vm8 = vcmask (!%p1713_p0), 1041408  }
 0x11d   : > { %1814 = vmatpush3.bf16.msra.mxu0 (!%p1713_p0), %v1813_v13  ;;  %s2839_s0 = sld [smem:[#allocation5 + %s674_s28]] (!%p1713_p0)  ;;  %1024 = vrot.lane.b32.xlu0 (!%p1713_p0), %v1022_v15, %s2421_s20  ;;  %p1005_p1 = scmp.gt.s32.totalorder (!%p1713_p0), %s2812_s21, 0  ;;  %v1047_v13 = vld [vmem:[#allocation17 + $0x8] sm:$0xff] (!%p1713_p0) }
 0x11e   : > { %1820 = vmatpush3.bf16.msra.mxu1 %v1819_v14  ;;  %1821 = vmatprep.subr.bf16.mxu0 %v2418_v4  ;;  %s650_s16 = scalar_lea.vmem [#allocation22], %s649_s29  ;;  %s652_s22 = scalar_lea.vmem [#allocation24], %s649_s29 }
 0x11f   : > { %v651_v18 = vld [vmem:[%s650_s16] sm:$0x1]  ;;  %1827 = vmatprep.subr.bf16.mxu1 %v2418_v4  ;;  %s656_s14 = scalar_lea.vmem [#allocation22], %s2825_s15  ;;  %s658_s24 = scalar_lea.vmem [#allocation24], %s2825_s15 }
 0x120   : > { %v653_v19 = vld [vmem:[%s652_s22] sm:$0x1]  ;;  %s629_s2 = scalar_lea.vmem [#allocation6], %s2830_s25  ;;  %s631_s29 = scalar_lea.vmem [#allocation9], %s2830_s25 }
 0x121   : > { %v657_v21 = vld [vmem:[%s656_s14] sm:$0x1]  ;;  %s635_s15 = scalar_lea.vmem [#allocation6], %s2832_s27  ;;  %s637_s18 = scalar_lea.vmem [#allocation9], %s2832_s27 }
 0x122   : > { %v659_v22 = vld [vmem:[%s658_s24] sm:$0x1]  ;;  %v661_v23 = vrot.slane %v657_v21, 7  ;;  %s670_s23 = scalar_lea.vmem [#allocation22], %s2837_s19  ;;  %s672_s25 = scalar_lea.vmem [#allocation24], %s2837_s19 }
 0x123   : > { %v665_v24 = vrot.slane %v659_v22, 7  ;;  %v630_v29 = vld [vmem:[%s629_s2] sm:$0x1]  ;;  %s676_s27 = scalar_lea.vmem [#allocation22], %s2839_s0  ;;  %s678_s26 = scalar_lea.vmem [#allocation24], %s2839_s0 }
 0x124   : > { %v632_v30 = vld [vmem:[%s631_s29] sm:$0x1]  ;;  %v2848_v31 = vsel %vm642_vm4, %v651_v18, %v661_v23  ;;  %s1006_s28 = scalar_select %p1005_p1, 1.0, 0.0 }
 0x125   : > { %v2851_v32 = vsel %vm642_vm4, %v653_v19, %v665_v24  ;;  %v636_v33 = vld [vmem:[%s635_s15] sm:$0x1]  ;;  %1771 = vmatmul.mubr.msk.f32.vlgmr.msra.gmra.mrb[0].mxu0 %vm696_vm5, %v2848_v31  ;;  %s2422_s21 = smov 112   ;;  %s2423_s16 = smov 96  }
 0x126   : > { %v638_v34 = vld [vmem:[%s637_s18] sm:$0x1]  ;;  %v640_v35 = vrot.slane %v636_v33, 7  ;;  %1823 = vmatpush3.bf16.msra.mxu0 %v1822_v25  ;;  %1792 = vmatprep.mubr.msk.f32.mxu0 %vm2419_vm3, %v2420_v12  ;;  %v1007_v57 = vstv %s1006_s28  ;;  %s2424_s22 = smov 48   ;;  %s2425_s20 = smov 80  }
 0x127   : > { %v645_v36 = vrot.slane %v638_v34, 7  ;;  %v671_v39 = vld [vmem:[%s670_s23] sm:$0x1]  ;;  %1824 = vmatprep.subr.bf16.mxu0 %v2418_v4  ;;  %s3080_s2 = sld [smem:[#allocation36_spill]]  ;;  %s1144_s29 = sadd.s32 3, %s2808_s17 }
 0x128   : > { %v2861_v40 = vsel %vm642_vm4, %v630_v29, %v640_v35  ;;  %v673_v42 = vld [vmem:[%s672_s25] sm:$0x1]  ;;  %s1146_s15 = sadd.s32 11, %s2808_s17  ;;  %s1145_s18 = sld [smem:[#allocation5 + %s1144_s29]] }
 0x129   : > { %v2864_v41 = vsel %vm642_vm4, %v632_v30, %v645_v36  ;;  %v677_v43 = vld [vmem:[%s676_s27] sm:$0x1]  ;;  %1782 = vmatmul.mubr.msk.f32.vlgmr.msra.gmra.mrb[0].mxu1 %vm696_vm5, %v2861_v40  ;;  %s1147_s23 = sld [smem:[#allocation5 + %s1146_s15]]  ;;  %s1722_s25 = sshll.u32 %s2542_s9, 1 }
 0x12a   : > { %v679_v44 = vld [vmem:[%s678_s26] sm:$0x1]  ;;  %v681_v45 = vrot.slane %v677_v43, 7  ;;  %1829 = vmatpush3.bf16.msra.mxu1 %v1828_v37  ;;  %1799 = vmatprep.mubr.msk.f32.mxu1 %vm2419_vm3, %v2420_v12  ;;  %s1142_s27 = scalar_lea.vmem [#allocation21], %s1722_s25 }
 0x12b   : > { %v685_v46 = vrot.slane %v679_v44, 7  ;;  %1826 = vmatpush3.bf16.msra.mxu0 %v1825_v38  ;;  %1830 = vmatprep.subr.bf16.mxu1 %v2418_v4 }
 0x12c   : > { %v2875_v48 = vsel %vm642_vm4, %v671_v39, %v681_v45 }
 0x12d   : > { %v2878_v49 = vsel %vm642_vm4, %v673_v42, %v685_v46  ;;  %1800 = vmatmul.mubr.msk.f32.vlgmr.msra.gmra.mrb[2].mxu1 %vm931_vm6, %v921_v47  ;;  %v1720_v19 = vld [vmem:[%s3080_s2] ss:$0 sm:$0xff] }
 0x12e   : > { %1793 = vmatmul.mubr.msk.f32.vlgmr.msra.gmra.mrb[2].mxu0 %vm696_vm5, %v2875_v48  ;;  %1806 = vmatprep.mubr.msk.f32.mxu1 %vm2419_vm3, %v2420_v12  ;;  %v1046_v12 = vld [vmem:[#allocation17] sm:$0xff]  ;;  %p1723_p6 = scmp.ne.s32.totalorder %s1145_s18, 0 }
 0x12f   : > { %v1831_v14 = vpack.c.bf16 %v1047_v13, %v1046_v12  ;;  %vm1153_vm9 = vcmask (!%p1723_p6), 253952   ;;  %s1152_s26 = scalar_lea.vmem (!%p1723_p6), [#allocation22], %s1147_s23  ;;  %s1155_s28 = scalar_lea.vmem (!%p1723_p6), [#allocation24], %s1147_s23 }
 0x130   : > { %1154 = vst.msk [vmem:[%s1152_s26] sm:$0x1] (!%p1723_p6), %vm1153_vm9, %v2861_v40  ;;  %1156 = vst.msk [vmem:[%s1155_s28] sm:$0x1] (!%p1723_p6), %vm1153_vm9, %v2864_v41 }
 0x131   : > { %1832 = vmatpush3.bf16.msra.mxu1 %v1831_v14 }
 0x18f   : > { %v1025_v4 = vpop.permute.xlu0 %1024 }
 0x1f8   : > { %v766_v50 = vpop.f32.mrb[0].mxu0 }
 0x1f9   : > { %v1772_v51 = vpop.f32.mrb[1].mxu0 }
 0x1fc   : > { %v839_v52 = vpop.f32.mrb[0].mxu1 }
 0x1fd   : > { %v840_v53 = vadd.f32 %v839_v52, %v766_v50  ;;  %v1783_v54 = vpop.f32.mrb[1].mxu1 }
 0x200   : > { %v1001_v56 = vpop.f32.mrb[2].mxu1 }
 0x201   : > { %v1002_v58 = vadd.f32 %v1717_v55, %v1001_v56  ;;  %v1801_v59 = vpop.f32.mrb[3].mxu1  ;;  %v916_v60 = vpop.f32.mrb[2].mxu0 }
 0x202   : > { %v920_v61 = vadd.f32 %v916_v60, %v840_v53  ;;  %v1794_v62 = vpop.f32.mrb[3].mxu0 }
 0x203   : > { %v1008_v63 = vmul.f32 %v1007_v57, %v1002_v58 }
 0x205   : > { %v1009_v0 = vadd.f32 %v1008_v63, %v920_v61 }
 0x207   : > { %v1719_v1 = vmul.f32 -1.442695, %v1009_v0 }
 0x209   : > { %2001 = vpow2.f32 %v1719_v1 }
 0x213   : > { %v2002_v2 = vpop.eup %2001 }
 0x214   : > { %v1014_v3 = vadd.f32 1.0, %v2002_v2 }
 0x216   : > { %2003 = vrcp.f32 %v1014_v3 }
 0x217   : > { %2005 = vtanh.f32 %v1009_v0 }
 0x220   : > { %v2004_v5 = vpop.eup %2003 }
 0x221   : > { %v1027_v6 = vmul.f32 %v2004_v5, %v1025_v4  ;;  %1018 = vrot.lane.b32.xlu0 %v2004_v5, %s2422_s21  ;;  %v2006_v7 = vpop.eup %2005 }
 0x223   : > { %1029 = vrot.lane.b32.xlu1 %v1027_v6, %s2423_s16 }
 0x293   : > { %v1019_v8 = vpop.permute.xlu0 %1018 }
 0x294   : > { %v1021_v9 = vmul.f32 %v2006_v7, %v1019_v8 }
 0x295   : > { %v1030_v10 = vpop.permute.xlu1 %1029 }
 0x296   : > { %v1032_v11 = vadd.f32 %v1030_v10, %v1021_v9 }
 0x298   : > { %2007 = vtanh.f32 %v1032_v11  ;;  %1045 = vst.msk [vmem:[#allocation3] sm:$0x3] %vm1043_vm7, %v1032_v11 }
 0x2a2   : > { %v2008_v15 = vpop.eup %2007 }
 0x2a3   : > { %1035 = vrot.lane.b32.xlu1 %v2008_v15, %s2424_s22 }
 0x315   : > { %v1036_v16 = vpop.permute.xlu1 %1035 }
 0x316   : > { %v1038_v17 = vmul.f32 %v2004_v5, %v1036_v16 }
 0x318   : > { %1040 = vrot.lane.b32.xlu0 %v1038_v17, %s2425_s20 }
 0x38a   : > { %v2891_v18 = vpop.permute.xlu0 %1040 }
 0x38b   : > { %1044 = vst.msk [vmem:[#allocation2] sm:$0x3] %vm1043_vm7, %v2891_v18  ;;  %1807 = vmatmul.mubr.msk.f32.vlgmr.msra.gmra.mrb[4].mxu1 %vm931_vm6, %v2891_v18 }
 0x45e   : > { %v1123_v20 = vpop.f32.mrb[4].mxu1 }
 0x45f   : > { %v1124_v21 = vadd.f32 %v1720_v19, %v1123_v20  ;;  %v1808_v22 = vpop.f32.mrb[5].mxu1 }
 0x461   : > { %v1128_v23 = vsel %vm1127_vm8, %v1124_v21, -inf }
 0x462   : > { %1129 = vmax.xlane.f32.xlu1 %v1128_v23 }
 0x4ef   : > { %v1130_v24 = vpop.xlane.xlu1 %1129 }
 0x4f0   : > { %v1131_v25 = vsub.f32 %v1124_v21, %v1130_v24 }
 0x4f2   : > { %v1132_v26 = vmul.f32 1.442695, %v1131_v25 }
 0x4f4   : > { %2009 = vpow2.f32 %v1132_v26 }
 0x4fe   : > { %v2010_v27 = vpop.eup %2009 }
 0x4ff   : > { %v1134_v28 = vsel %vm1127_vm8, %v2010_v27, 0.0 }
 0x500   : > { %1135 = vadd.xlane.f32.xlu0 %v1134_v28 }
 0x58d   : > { %v1136_v29 = vpop.xlane.xlu0 %1135 }
 0x58e   : > { %2011 = vlog2.f32 %v1136_v29 }
 0x598   : > { %v2012_v30 = vpop.eup %2011 }
 0x599   : > { %v1138_v33 = vmul.f32 0.6931472, %v2012_v30  ;;  %1151 = sbr.rel (%p1723_p6) target bundleno = 1440 (0x5a0), region = 120 }
 0x59b   : > { %v1139_v34 = vadd.f32 %v1138_v33, %v1130_v24 }
 0x59d   : > { %v1140_v35 = vsub.f32 %v1124_v21, %v1139_v34 }
 0x59f   : > { %1143 = vst [vmem:[%s1142_s27] sm:$0x3] %v1140_v35 }
 0x5a0 PF: > { %s1157_s19 = sadd.s32 4, %s2808_s17  ;;  %s1159_s0 = sadd.s32 12, %s2808_s17 }
 0x5a1   : > { %s1158_s21 = sld [smem:[#allocation5 + %s1157_s19]] }
 0x5a2   : > { %s1160_s16 = sld [smem:[#allocation5 + %s1159_s0]] }
 0x5a7   : > { %p1724_p11 = scmp.ne.s32.totalorder %s1158_s21, 0 }
 0x5a8   : > { %vm1166_vm10 = vcmask (!%p1724_p11), 254977   ;;  %s1165_s22 = scalar_lea.vmem (!%p1724_p11), [#allocation22], %s1160_s16  ;;  %s1168_s20 = scalar_lea.vmem (!%p1724_p11), [#allocation24], %s1160_s16 }
 0x5a9   : > { %1164 = sbr.rel (%p1724_p11) target bundleno = 1456 (0x5b0), region = 124  ;;  %1167 = vst.msk [vmem:[%s1165_s22 - $0x1] sm:$0x2] (!%p1724_p11), %vm1166_vm10, %v2861_v40  ;;  %1169 = vst.msk [vmem:[%s1168_s20 - $0x1] sm:$0x2] (!%p1724_p11), %vm1166_vm10, %v2864_v41 }
 0x5b0 PF: > { %p1725_p7 = scmp.le.s32.totalorder %s2815_s30, 0 }
 0x5b1   : > { %v1175_v36 = vld [vmem:[#allocation18 + $0x8] sm:$0xff] (!%p1725_p7)  ;;  %v1177_v37 = vld [vmem:[#allocation18 + $0x18] sm:$0xff] (!%p1725_p7)  ;;  %v1174_v38 = vld [vmem:[#allocation18] sm:$0xff] (!%p1725_p7)  ;;  %v2426_v45 = vmov (!%p1725_p7), 0.0   ;;  %s2427_s14 = smov (!%p1725_p7), 64   ;;  %s2428_s30 = smov (!%p1725_p7), 32   ;;  %v1411_v3 = vlaneseq (!%p1725_p7) }
 0x5b2   : > { %1173 = sbr.rel (%p1725_p7) target bundleno = 2190 (0x88e), region = 128  ;;  %v1841_v39 = vpack.c.bf16 (!%p1725_p7), %v1177_v37, %v1175_v36  ;;  %v1176_v42 = vld [vmem:[#allocation18 + $0x10] sm:$0xff] (!%p1725_p7)  ;;  %v1179_v43 = vld [vmem:[#allocation18 + $0x28] sm:$0xff] (!%p1725_p7)  ;;  %v1181_v44 = vld [vmem:[#allocation18 + $0x38] sm:$0xff] (!%p1725_p7)  ;;  %1325 = vmatprep.mubr.f32.mxu0 (!%p1725_p7), %v2426_v45  ;;  %1254 = vmatprep.mubr.f32.mxu1 (!%p1725_p7), %v2426_v45  ;;  %s2429_s22 = smov (!%p1725_p7), 96  }
 0x5b3   : > { %v1843_v46 = vpack.c.bf16 (!%p1725_p7), %v1176_v42, %v1174_v38  ;;  %v1845_v47 = vpack.c.bf16 (!%p1725_p7), %v1181_v44, %v1179_v43  ;;  %v1178_v40 = vld [vmem:[#allocation18 + $0x20] sm:$0xff] (!%p1725_p7)  ;;  %v1180_v50 = vld [vmem:[#allocation18 + $0x30] sm:$0xff] (!%p1725_p7)  ;;  %v1183_v51 = vld [vmem:[#allocation20 + $0x8] sm:$0xff] (!%p1725_p7)  ;;  %1435 = vrot.lane.b32.xlu0 (!%p1725_p7), %v2851_v32, %s2427_s14  ;;  %1430 = vrot.lane.b32.xlu1 (!%p1725_p7), %v2878_v49, %s2428_s30  ;;  %v1412_v4 = vshrl.u32 (!%p1725_p7), %v1411_v3, 7  ;;  %s1467_s20 = sld [smem:[#allocation5 + %s1144_s29]] (!%p1725_p7) }
 0x5b4   : > { %1842 = vmatprep.subr.bf16.mxu0 (!%p1725_p7), %v1841_v39  ;;  %v1185_v41 = vld [vmem:[#allocation20 + $0x18] sm:$0xff] (!%p1725_p7)  ;;  %v1335_v53 = vld [vmem:[%s3036_s12 + $0x18] sm:$0xff] (!%p1725_p7)  ;;  %v1847_v54 = vpack.c.bf16 (!%p1725_p7), %v1180_v50, %v1178_v40  ;;  %v1184_v57 = vld [vmem:[#allocation20 + $0x10] sm:$0xff] (!%p1725_p7)  ;;  %s1468_s14 = sld [smem:[#allocation5 + %s1146_s15]] (!%p1725_p7) }
 0x5b5   : > { %v1333_v52 = vld [vmem:[%s3036_s12 + $0x8] sm:$0xff] (!%p1725_p7)  ;;  %1844 = vmatpush1.bf16.msra.mxu0 (!%p1725_p7), %v1843_v46  ;;  %v1833_v55 = vpack.c.bf16 (!%p1725_p7), %v1185_v41, %v1183_v51  ;;  %v1182_v56 = vld [vmem:[#allocation20] sm:$0xff] (!%p1725_p7)  ;;  %v1332_v32 = vld [vmem:[%s3036_s12] sm:$0xff] (!%p1725_p7)  ;;  %v1417_v6 = vsub.s32 (!%p1725_p7), 1, %v1412_v4  ;;  %v1413_v9 = vsub.s32 (!%p1725_p7), 0, %v1412_v4 }
 0x5b6   : > { %1846 = vmatprep.subr.bf16.mxu0 (!%p1725_p7), %v1845_v47  ;;  %v1849_v49 = vpack.c.bf16 (!%p1725_p7), %v1335_v53, %v1333_v52  ;;  %v1835_v58 = vpack.c.bf16 (!%p1725_p7), %v1184_v57, %v1182_v56  ;;  %v1334_v59 = vld [vmem:[%s3036_s12 + $0x10] sm:$0xff] (!%p1725_p7)  ;;  %v1187_v60 = vld [vmem:[#allocation20 + $0x28] sm:$0xff] (!%p1725_p7)  ;;  %v1188_v0 = vld [vmem:[#allocation20 + $0x30] sm:$0xff] (!%p1725_p7) }
 0x5b7   : > { %v1189_v61 = vld [vmem:[#allocation20 + $0x38] sm:$0xff] (!%p1725_p7)  ;;  %1834 = vmatprep.subr.bf16.mxu1 (!%p1725_p7), %v1833_v55  ;;  %v1186_v63 = vld [vmem:[#allocation20 + $0x20] sm:$0xff] (!%p1725_p7)  ;;  %v1851_v2 = vpack.c.bf16 (!%p1725_p7), %v1334_v59, %v1332_v32  ;;  %v1409_v5 = vld [vmem:[%s3037_s13] sm:$0x3] (!%p1725_p7) }
 0x5b8   : > { %v1837_v62 = vpack.c.bf16 (!%p1725_p7), %v1189_v61, %v1187_v60  ;;  %1836 = vmatpush1.bf16.msra.mxu1 (!%p1725_p7), %v1835_v58  ;;  %v1839_v1 = vpack.c.bf16 (!%p1725_p7), %v1188_v0, %v1186_v63  ;;  %v1418_v7 = vrot.slane (!%p1725_p7), %v1409_v5, %v1417_v6  ;;  %v1414_v10 = vrot.slane (!%p1725_p7), %v1409_v5, %v1413_v9 }
 0x5b9   : > { %1848 = vmatpush1.bf16.msra.mxu0 %v1847_v54  ;;  %p1731_p2 = scmp.ne.s32.totalorder %s1467_s20, 1 }
 0x5ba   : > { %1838 = vmatprep.subr.bf16.mxu1 %v1837_v62  ;;  %1850 = vmatprep.subr.bf16.mxu0 %v1849_v49  ;;  %vm1474_vm11 = vcmask (!%p1731_p2), 253952   ;;  %s1473_s24 = scalar_lea.vmem (!%p1731_p2), [#allocation22], %s1468_s14  ;;  %s1480_s29 = scalar_lea.vmem (!%p1731_p2), [#allocation24], %s1468_s14 }
 0x5bc   : > { %1727 = vmatmul.mubr.msk.f32.vlgmr.msra.gmra.mrb[0].mxu0 %vm696_vm5, %v2875_v48  ;;  %1840 = vmatpush1.bf16.msra.mxu1 %v1839_v1 }
 0x5bd   : > { %1852 = vmatpush1.bf16.msra.mxu0 %v1851_v2  ;;  %1400 = vmatprep.mubr.f32.mxu0 %v2426_v45 }
 0x5bf   : > { %1726 = vmatmul.mubr.msk.f32.vlgmr.msra.gmra.mrb[0].mxu1 %vm696_vm5, %v2848_v31 }
 0x5c4   : > { %1728 = vmatmul.mubr.msk.f32.vlgmr.msra.gmra.mrb[0].mxu0 %vm931_vm6, %v2891_v18 }
 0x625   : > { %v1436_v20 = vpop.permute.xlu0 %1435  ;;  %v1431_v25 = vpop.permute.xlu1 %1430 }
 0x692   : > { %v1256_v8 = vpop.f32.mrb[0].mxu1 }
 0x693   : > { %v1258_v48 = vpop.f32.mrb[1].mxu1 }
 0x697   : > { %v1402_v11 = vpop.f32.mrb[0].mxu0 }
 0x698   : > { %v1853_v12 = vadd.f32 %v1402_v11, %v1256_v8  ;;  %v1404_v13 = vpop.f32.mrb[1].mxu0 }
 0x699   : > { %v1854_v14 = vadd.f32 %v1404_v13, %v1258_v48 }
 0x69a   : > { %v1421_v31 = vadd.f32 %v1853_v12, %v1414_v10 }
 0x69b   : > { %v1422_v15 = vadd.f32 %v1854_v14, %v1418_v7 }
 0x69c   : > { %v1729_v16 = vmul.f32 -1.442695, %v1421_v31  ;;  %2013 = vtanh.f32 %v1421_v31 }
 0x69d   : > { %v1730_v34 = vmul.f32 -1.442695, %v1422_v15 }
 0x69e   : > { %2015 = vpow2.f32 %v1729_v16 }
 0x6a6   : > { %v2014_v17 = vpop.eup %2013 }
 0x6a7   : > { %1446 = vrot.lane.b32.xlu0 %v2014_v17, %s2428_s30 }
 0x6a8   : > { %v2016_v18 = vpop.eup %2015 }
 0x6a9   : > { %v1426_v19 = vadd.f32 1.0, %v2016_v18 }
 0x6ab   : > { %2017 = vrcp.f32 %v1426_v19 }
 0x6b5   : > { %v2018_v21 = vpop.eup %2017 }
 0x6b6   : > { %v1438_v22 = vmul.f32 %v2018_v21, %v1436_v20  ;;  %v1433_v27 = vmul.f32 %v2018_v21, %v1431_v25 }
 0x6b8   : > { %1440 = vrot.lane.b32.xlu1 %v1438_v22, %s2429_s22 }
 0x719   : > { %v1447_v23 = vpop.permute.xlu0 %1446 }
 0x71a   : > { %v1449_v24 = vmul.f32 %v2018_v21, %v1447_v23 }
 0x71c   : > { %1451 = vrot.lane.b32.xlu0 %v1449_v24, %s2428_s30  ;;  %s2430_s30 = smov (!%p1731_p2), 96  }
 0x72a   : > { %v1441_v26 = vpop.permute.xlu1 %1440 }
 0x72b   : > { %v1443_v28 = vadd.f32 %v1441_v26, %v1433_v27 }
 0x78e   : > { %v1452_v29 = vpop.permute.xlu0 %1451 }
 0x78f   : > { %v1454_v30 = vadd.f32 %v1452_v29, %v1443_v28 }
 0x791   : > { %2019 = vtanh.f32 %v1454_v30  ;;  %1477 = vrot.lane.b32.xlu0 (!%p1731_p2), %v1454_v30, %s2430_s30 }
 0x792   : > { %2021 = vpow2.f32 %v1730_v34 }
 0x79b   : > { %v2020_v33 = vpop.eup %2019 }
 0x79c   : > { %1463 = vrot.lane.b32.xlu1 %v2020_v33, %s2429_s22  ;;  %v2022_v35 = vpop.eup %2021 }
 0x79d   : > { %v1458_v36 = vadd.f32 1.0, %v2022_v35 }
 0x79f   : > { %2023 = vrcp.f32 %v1458_v36 }
 0x7a9   : > { %v2024_v37 = vpop.eup %2023 }
 0x803   : > { %v1478_v42 = vpop.permute.xlu0 (!%p1731_p2), %1477 }
 0x804   : > { %1481 = vst.msk [vmem:[%s1480_s29] sm:$0x1] (!%p1731_p2), %vm1474_vm11, %v1478_v42 }
 0x809   : > { %1472 = sbr.rel (%p1731_p2) target bundleno = 2066 (0x812), region = 132 }
 0x80e   : > { %v1464_v38 = vpop.permute.xlu1 %1463 }
 0x80f   : > { %v1466_v39 = vmul.f32 %v2024_v37, %v1464_v38 }
 0x811   : > { %1475 = vst.msk [vmem:[%s1473_s24] sm:$0x1] %vm1474_vm11, %v1466_v39 }
 0x812 PF: > { %s1482_s15 = sld [smem:[#allocation5 + %s1157_s19]] }
 0x813   : > { %s1483_s2 = sld [smem:[#allocation5 + %s1159_s0]] }
 0x818   : > { %p1732_p3 = scmp.ne.s32.totalorder %s1482_s15, 1 }
 0x819   : > { %vm1489_vm12 = vcmask (!%p1732_p3), 254977   ;;  %s2431_s18 = smov (!%p1732_p3), 96   ;;  %s1488_s23 = scalar_lea.vmem (!%p1732_p3), [#allocation22], %s1483_s2 }
 0x81a   : > { %1487 = sbr.rel (%p1732_p3) target bundleno = 2190 (0x88e), region = 136  ;;  %1492 = vrot.lane.b32.xlu0 (!%p1732_p3), %v1454_v30, %s2431_s18  ;;  %1490 = vst.msk [vmem:[%s1488_s23 - $0x1] sm:$0x2] (!%p1732_p3), %vm1489_vm12, %v1466_v39  ;;  %s1495_s25 = scalar_lea.vmem (!%p1732_p3), [#allocation24], %s1483_s2 }
 0x88c   : > { %v1493_v43 = vpop.permute.xlu0 %1492 }
 0x88d   : > { %1496 = vst.msk [vmem:[%s1495_s25 - $0x1] sm:$0x2] %vm1489_vm12, %v1493_v43 }
 0x88e PF: > { %p1951_p4 = scmp.eq.s32.totalorder %s2542_s9, 8  ;;  %s2432_s27 = smov [#allocation22]  }
 0x88f   : > { %s1516_s19 = sshll.u32 %s2432_s27, 4  ;;  %s1517_s19 = int_to_ptr.vmem [resolvable:$true] %s1516_s19 }
 0x890   : > { %s2287_s17 = scalar_lea.vmem %s1517_s19, 384  ;;  %p2294_p12 = scmp.lt.s32.totalorder %s1517_s19, %s1517_s19 }
 0x891   : > { %p2288_p9 = scmp.ne.s32.totalorder %s1517_s19, %s2287_s17  ;;  %p2295_p5 = scmp.lt.s32.totalorder %s2287_s17, %s2287_s17 }
 0x893   : > { %p2289_p8 = pnand %p2288_p9, %p1951_p4  ;;  %p2296_p13 = por %p2295_p5, %p2294_p12 }
 0x895   : > { %p2290_p10 = pneg %p2289_p8 }
 0x897   : > { %p2297_p0 = pnand %p2296_p13, %p2290_p10 }
 0x899   : > { %2300 = shalt.err (!%p2297_p0)
}
 0x89a   : > { %s3081_s28 = sld [smem:[#allocation38_spill]] }
 0x8a0   : > { %s2301_s21 = scalar_lea.hbm %s3081_s28, 384 }
 0x8a1   : > { %p2302_p1 = scmp.ne.s32.totalorder %s3081_s28, %s2301_s21  ;;  %p2307_p7 = scmp.lt.u32.totalorder %s2301_s21, %s3081_s28 }
 0x8a3   : > { %p2303_p6 = pnand %p2302_p1, %p1951_p4 }
 0x8a5   : > { %p2304_p11 = pneg %p2303_p6 }
 0x8a7   : > { %p2309_p2 = pnand %p2307_p7, %p2304_p11 }
 0x8a9   : > { %2312 = shalt.err (!%p2309_p2)
}
 0x8aa   : > { %s2433_s30 = smov 128   ;;  %s2434_s24 = smov 8  }
 0x8ab   : > { %1896 = dma.vmem_to_hbm [thread:$0]  (%p1951_p4), %s1517_s19, 384, %s3081_s28, [#allocation23], %s2433_s30, %s2433_s30, %s2434_s24  }
 0x8ac   : > { %s2435_s2 = smov [#allocation21]  }
 0x8ad   : > { %s1503_s18 = sshll.u32 %s2435_s2, 4  ;;  %s1504_s18 = int_to_ptr.vmem [resolvable:$true] %s1503_s18 }
 0x8ae   : > { %s2313_s23 = scalar_lea.vmem %s1504_s18, 288  ;;  %p2320_p10 = scmp.lt.s32.totalorder %s1504_s18, %s1504_s18 }
 0x8af   : > { %p2314_p3 = scmp.ne.s32.totalorder %s1504_s18, %s2313_s23  ;;  %p2321_p12 = scmp.lt.s32.totalorder %s2313_s23, %s2313_s23 }
 0x8b1   : > { %p2315_p9 = pnand %p2314_p3, %p1951_p4  ;;  %p2322_p5 = por %p2321_p12, %p2320_p10 }
 0x8b3   : > { %p2316_p8 = pneg %p2315_p9 }
 0x8b5   : > { %p2323_p13 = pnand %p2322_p5, %p2316_p8 }
 0x8b7   : > { %2326 = shalt.err (!%p2323_p13)
}
 0x8b8   : > { %s3082_s17 = sld [smem:[#allocation37_spill]] }
 0x8be   : > { %s2327_s0 = scalar_lea.hbm %s3082_s17, 288 }
 0x8bf   : > { %p2328_p0 = scmp.ne.s32.totalorder %s3082_s17, %s2327_s0  ;;  %p2333_p11 = scmp.lt.u32.totalorder %s2327_s0, %s3082_s17 }
 0x8c1   : > { %p2329_p1 = pnand %p2328_p0, %p1951_p4 }
 0x8c3   : > { %p2330_p6 = pneg %p2329_p1 }
 0x8c5   : > { %p2335_p7 = pnand %p2333_p11, %p2330_p6 }
 0x8c7   : > { %2338 = shalt.err (!%p2335_p7)
}
 0x8c8   : > { %s2436_s22 = smov 32   ;;  %s2437_s20 = smov 2  }
 0x8c9   : > { %1894 = dma.vmem_to_hbm [thread:$0]  (%p1951_p4), %s1504_s18, 288, %s3082_s17, [#allocation8], %s2436_s22, %s2436_s22, %s2437_s20  }
 0x8ca   : > { %s2438_s15 = smov [#allocation24]  }
 0x8cb   : > { %s1529_s2 = sshll.u32 %s2438_s15, 4  ;;  %s1530_s2 = int_to_ptr.vmem [resolvable:$true] %s1529_s2 }
 0x8cc   : > { %s2339_s23 = scalar_lea.vmem %s1530_s2, 384  ;;  %p2346_p8 = scmp.lt.s32.totalorder %s1530_s2, %s1530_s2 }
 0x8cd   : > { %p2340_p2 = scmp.ne.s32.totalorder %s1530_s2, %s2339_s23  ;;  %p2347_p10 = scmp.lt.s32.totalorder %s2339_s23, %s2339_s23 }
 0x8cf   : > { %p2341_p3 = pnand %p2340_p2, %p1951_p4  ;;  %p2348_p12 = por %p2347_p10, %p2346_p8 }
 0x8d1   : > { %p2342_p9 = pneg %p2341_p3 }
 0x8d3   : > { %p2349_p5 = pnand %p2348_p12, %p2342_p9 }
 0x8d5   : > { %2352 = shalt.err (!%p2349_p5)
}
 0x8d6   : > { %s3083_s0 = sld [smem:[#allocation39_spill]] }
 0x8dc   : > { %s3084_s26 = smov %s3083_s0  ;;  %s2353_s19 = scalar_lea.hbm %s3083_s0, 384 }
 0x8dd   : > { %p2354_p13 = scmp.ne.s32.totalorder %s3084_s26, %s2353_s19  ;;  %p2359_p6 = scmp.lt.u32.totalorder %s2353_s19, %s3084_s26 }
 0x8df   : > { %p2355_p0 = pnand %p2354_p13, %p1951_p4 }
 0x8e1   : > { %p2356_p1 = pneg %p2355_p0 }
 0x8e3   : > { %p2361_p11 = pnand %p2359_p6, %p2356_p1 }
 0x8e5   : > { %2364 = shalt.err (!%p2361_p11)
}
 0x8e6   : > { %1898 = dma.vmem_to_hbm [thread:$0]  (%p1951_p4), %s1530_s2, 384, %s3084_s26, [#allocation23], %s2433_s30, %s2433_s30, %s2434_s24  }
 0x8e7   : > { %2392 = dma.done.wait (%p1951_p4), [#allocation8], 288  }
 0x8e8   : > { %2394 = vsyncadd (%p1951_p4), [#allocation8], 4294967008 }
 0x8e9   : > { %2396 = dma.done.wait (%p1951_p4), [#allocation23], 768  }
 0x8ea   : > { %2398 = vsyncadd (%p1951_p4), [#allocation23], 4294966528 }
 0x8eb PF: > { %s3085_s29 = sld [smem:[#allocation33_spill]] }
 0x8f1   : > { %s38_s0 = sadd.s32 1, %s3085_s29  }
 0x8f2   : > { %p35_p7 = scmp.ge.s32.totalorder %s38_s0, 11  }
 0x8f4   :  { %37 = sbr.rel (!%p35_p7) target bundleno = 26 (0x1a), region = 198 }
 0x8fb   :  { %1553 = vsyncpa [#allocation7], 1 }
 0x8fc   :  { %1555 = vsyncpa [#allocation7 + $0x1], 1 }
 0x8fd   :  { %1556 = vsyncpa [#allocation10], 1 }
 0x8fe   :  { %1557 = vsyncpa [#allocation13], 1 }
 0x8ff   :  { %1558 = vsyncpa [#allocation16], 1 }
 0x900   :  { %1559 = vsyncpa [#allocation19], 1 }
 0x901   :  { %1560 = vsyncpa [#allocation8], 1 }
 0x902   :  { %1562 = vsyncpa [#allocation8 + $0x1], 1 }
 0x903   :  { %1563 = vsyncpa [#allocation23], 1 }

</bundles_post_ra>
